<compile_context>
chip_gen: v6e
topology: v6e:2x2x1
jax: 0.10.0
libtpu: 0.0.40
codegen_flags: <defaults>
</compile_context>

<pallas_src>
import jax
import jax.numpy as jnp
from jax.experimental import pallas as pl
from jax.experimental.pallas import tpu as pltpu

# ----------------------------- configuration --------------------------------
B, C, H, W = 2, 4, 16, 16      # input image (NCHW)
HIDDEN = 32                    # vision-module hidden channels
K9 = 9 * C                     # 3x3 * C = 36 im2col columns (built in-kernel)
OPT_ITERS = 3                  # synthetic optim iterations
OPT_LR = 0.5
OPT_IMG_W = 0.1

# padded / flattened pixel geometry
Hp, Wp = H + 2, W + 2          # spatially zero-padded image
HALO = Wp + 1                  # flat-index halo needed by a 3x3 stencil
M_PIX = B * Hp * Wp            # total padded pixels (output computed for all of them,
                               # border/pad lanes are discarded in the wrapper)
MAX_TM = 4096                  # lane-tile cap (review: 2048-8192 for real resolutions)
NTILES = max(2, -(-M_PIX // MAX_TM))            # >= 2 so both v7x TCs get work
TM = ((-(-M_PIX // NTILES)) + 127) // 128 * 128  # lane-dense tile, multiple of 128
M_PAD = NTILES * TM                              # padded pixel count seen by the kernel
TMH = TM + 2 * HALO                              # slab width = tile + halo


# ------------------------------ Pallas kernel --------------------------------
def carts_kernel(img_ref, w1b_ref, w2b_ref, out_ref):
    """Fused vision net + optim refinement over one lane-dense tile of TM pixels.

    img_ref : (1, C, TM + 2*HALO) bf16  zero-padded image, flat pixel layout, with halo
    w1b_ref : (HIDDEN, 9*C + 1)  f32    [conv3x3 weights, column order (ky,kx,c) | b1]
    w2b_ref : (1, HIDDEN + 1)    f32    [conv1x1 weights | b2]
    out_ref : (2, TM)            f32    row 0 = net_pred, row 1 = optim-refined pred
    """
    img = img_ref[0].astype(jnp.float32)           # (C, TMH); f32 from here (v5e-safe)
    w1b = w1b_ref[...]                             # (HIDDEN, 9C+1)
    w2b = w2b_ref[...]                             # (1, HIDDEN+1)

    # ---- vision module: conv3x3 built in-kernel from 9 static lane-shifted slices ----
    acc = jnp.zeros((HIDDEN, TM), jnp.float32)
    k = 0
    for ky in range(3):
        for kx in range(3):
            s = HALO + (ky - 1) * Wp + (kx - 1)    # static lane offset of this tap
            xs = img[:, s:s + TM]                  # (C, TM)
            acc = acc + jnp.dot(w1b[:, k * C:(k + 1) * C], xs,
                                preferred_element_type=jnp.float32)
            k += 1
    h = jnp.maximum(acc + w1b[:, K9:K9 + 1], 0.0)  # (HIDDEN, TM)  + b1, ReLU

    # conv1x1 on the MXU (was VPU mul + XLU reduce): (1,HIDDEN) @ (HIDDEN,TM)
    logit = jnp.dot(w2b[:, :HIDDEN], h,
                    preferred_element_type=jnp.float32) + w2b[:, HIDDEN:HIDDEN + 1]
    net_pred = jax.nn.sigmoid(logit)               # (1, TM)

    # per-pixel mean intensity over channels = centre tap of the slab
    intensity = jnp.mean(img[:, HALO:HALO + TM], axis=0, keepdims=True)  # (1, TM)

    # ---- optim module: iterative elementwise logit refinement ----
    # u -= lr*((s - net_pred) + w*(s - intensity)) == lr*(coef*s - target)   (hoisted)
    target = net_pred + OPT_IMG_W * intensity
    coef = 1.0 + OPT_IMG_W
    u = 2.0 * net_pred - 1.0
    for _ in range(OPT_ITERS):
        s_ = jax.nn.sigmoid(u)
        u = u - OPT_LR * (coef * s_ - target)
    refined = jax.nn.sigmoid(u)

    # two lane-dense row stores (kept separate instead of a sub-tile sublane concat,
    # which is the compile-robust choice; cost is one extra masked vst per tile)
    out_ref[0:1, :] = net_pred
    out_ref[1:2, :] = refined


# ------------------------------ glue / wrapper --------------------------------
@jax.jit
def carts_base_forward(x, w_conv1, b_conv1, w_conv2, b_conv2):
    """Mimics CaRTSBase.forward(data): returns dict with 'net_pred' and 'pred'."""
    # zero-pad spatially, move C to front, flatten pixels: (C, B*Hp*Wp).
    xp = jnp.pad(x, ((0, 0), (0, 0), (1, 1), (1, 1)))
    flat = xp.transpose(1, 0, 2, 3).reshape(C, M_PIX)
    flat = jnp.pad(flat, ((0, 0), (HALO, HALO + M_PAD - M_PIX)))
    # per-tile slabs with halo (only ~2*HALO/TM duplicated bytes); bf16 HBM stream.
    slabs = jnp.stack([flat[:, t * TM:t * TM + TMH] for t in range(NTILES)], axis=0)
    slabs = slabs.astype(jnp.bfloat16)                              # (NTILES, C, TMH)

    # conv3x3 weight (Cout, Cin, 3, 3) -> (Cout, 9*Cin) with column order (ky, kx, c),
    # packed with b1; conv1x1 weight packed with b2.
    w1t = w_conv1.transpose(0, 2, 3, 1).reshape(HIDDEN, K9).astype(jnp.float32)
    w1b = jnp.concatenate([w1t, b_conv1.reshape(HIDDEN, 1).astype(jnp.float32)], axis=1)
    w2b = jnp.concatenate([w_conv2.reshape(1, HIDDEN).astype(jnp.float32),
                           b_conv2.reshape(1, 1).astype(jnp.float32)], axis=1)

    cost = pl.CostEstimate(
        flops=2 * M_PAD * (K9 * HIDDEN + HIDDEN) + 10 * M_PAD * OPT_ITERS,
        transcendentals=(OPT_ITERS + 2) * M_PAD,
        bytes_accessed=2 * NTILES * C * TMH
        + 4 * (HIDDEN * (K9 + 1) + HIDDEN + 1)
        + 4 * 2 * M_PAD,
    )

    out = pl.pallas_call(
        carts_kernel,
        out_shape=jax.ShapeDtypeStruct((2, M_PAD), jnp.float32),
        grid_spec=pltpu.PrefetchScalarGridSpec(
            num_scalar_prefetch=0,
            grid=(NTILES,),
            in_specs=[
                pl.BlockSpec((1, C, TMH), lambda i: (i, 0, 0)),        # image slab
                pl.BlockSpec((HIDDEN, K9 + 1), lambda i: (0, 0)),      # [w1 | b1]
                pl.BlockSpec((1, HIDDEN + 1), lambda i: (0, 0)),       # [w2 | b2]
            ],
            out_specs=pl.BlockSpec((2, TM), lambda i: (0, i)),
        ),
        compiler_params=pltpu.CompilerParams(
            dimension_semantics=("parallel",)),
        cost_estimate=cost,
    )(slabs, w1b, w2b)

    # drop lane padding and spatial border, back to NCHW
    out = out[:, :M_PIX].reshape(2, B, Hp, Wp)[:, :, 1:1 + H, 1:1 + W]
    net_pred = out[0][:, None, :, :]
    pred = out[1][:, None, :, :]
    # TODO(synk): data['net'] holds the nn.Module object in PyTorch; no array equivalent.
    return {"net_pred": net_pred, "pred": pred}


def reference_forward(x, w_conv1, b_conv1, w_conv2, b_conv2):
    """Pure-JAX reference for correctness checking."""
    hi = jax.lax.conv(x, w_conv1, (1, 1), "SAME",
                      precision=jax.lax.Precision.HIGHEST)
    hi = jnp.maximum(hi + b_conv1[None, :, None, None], 0.0)
    logit = jax.lax.conv(hi, w_conv2, (1, 1), "SAME",
                         precision=jax.lax.Precision.HIGHEST)
    logit = logit + b_conv2[None, :, None, None]
    net_pred = jax.nn.sigmoid(logit)                       # (B, 1, H, W)
    intensity = jnp.mean(x, axis=1, keepdims=True)         # (B, 1, H, W)
    u = 2.0 * net_pred - 1.0
    for _ in range(OPT_ITERS):
        s = jax.nn.sigmoid(u)
        u = u - OPT_LR * ((s - net_pred) + OPT_IMG_W * (s - intensity))
    return net_pred, jax.nn.sigmoid(u)


# ---------------------------------- main --------------------------------------
if __name__ == "__main__":
    key = jax.random.PRNGKey(0)
    k_x, k_w1, k_b1, k_w2, k_b2 = jax.random.split(key, 5)

    # snap the image to the bf16 grid so the kernel's bf16 HBM storage is lossless and
    # both paths see identical inputs (tolerance stays tight).
    x = jax.random.normal(k_x, (B, C, H, W), jnp.float32)
    x = x.astype(jnp.bfloat16).astype(jnp.float32)                            # NCHW image
    w_conv1 = jax.random.normal(k_w1, (HIDDEN, C, 3, 3), jnp.float32) * 0.1   # torch conv layout
    b_conv1 = jax.random.normal(k_b1, (HIDDEN,), jnp.float32) * 0.1
    w_conv2 = jax.random.normal(k_w2, (1, HIDDEN, 1, 1), jnp.float32) * 0.1
    b_conv2 = jax.random.normal(k_b2, (1,), jnp.float32) * 0.1

    data = carts_base_forward(x, w_conv1, b_conv1, w_conv2, b_conv2)
    jax.block_until_ready(data)

    ref_net_pred, ref_pred = reference_forward(x, w_conv1, b_conv1, w_conv2, b_conv2)
    assert data["net_pred"].shape == (B, 1, H, W)
    assert data["pred"].shape == (B, 1, H, W)
    assert jnp.allclose(data["net_pred"], ref_net_pred, atol=1e-3, rtol=1e-3)
    assert jnp.allclose(data["pred"], ref_pred, atol=1e-3, rtol=1e-3)

    print("KERNEL_OK")
</pallas_src>

<mosaic_0001>
module attributes {stable_mosaic.version = 11 : i64} {
  func.func @carts_kernel(%arg0: i32, %arg1: memref<1x4x422xbf16, #tpu.memory_space<vmem>>, %arg2: memref<32x37xf32, #tpu.memory_space<vmem>>, %arg3: memref<1x33xf32, #tpu.memory_space<vmem>>, %arg4: memref<2x384xf32, #tpu.memory_space<vmem>>) attributes {dimension_semantics = [#tpu.dimension_semantics<parallel>], iteration_bounds = array<i64: 2>, scalar_prefetch = 0 : i64, scratch_operands = 0 : i64, tpu.core_type = #tpu.core_type<tc>, window_params = [{transform_indices = @transform_0, window_bounds = array<i64: 1, 4, 422>}, {pipeline_mode = #tpu.pipeline_mode<synchronous>, transform_indices = @transform_1, window_bounds = array<i64: 32, 37>}, {pipeline_mode = #tpu.pipeline_mode<synchronous>, transform_indices = @transform_2, window_bounds = array<i64: 1, 33>}, {transform_indices = @transform_3, window_bounds = array<i64: 2, 384>}]} {
    %c0 = arith.constant 0 : index
    %c0_0 = arith.constant 0 : index
    %c0_1 = arith.constant 0 : index
    %0 = vector.load %arg1[%c0, %c0_0, %c0_1] : memref<1x4x422xbf16, #tpu.memory_space<vmem>>, vector<1x4x422xbf16>
    %1 = vector.shape_cast %0 : vector<1x4x422xbf16> to vector<4x422xbf16>
    %2 = arith.extf %1 : vector<4x422xbf16> to vector<4x422xf32>
    %c0_2 = arith.constant 0 : index
    %c0_3 = arith.constant 0 : index
    %3 = vector.load %arg2[%c0_2, %c0_3] : memref<32x37xf32, #tpu.memory_space<vmem>>, vector<32x37xf32>
    %c0_4 = arith.constant 0 : index
    %c0_5 = arith.constant 0 : index
    %4 = vector.load %arg3[%c0_4, %c0_5] : memref<1x33xf32, #tpu.memory_space<vmem>>, vector<1x33xf32>
    %cst = arith.constant 0.000000e+00 : f32
    %5 = vector.broadcast %cst : f32 to vector<32x384xf32>
    %6 = vector.extract_strided_slice %2 {offsets = [0, 0], sizes = [4, 384], strides = [1, 1]} : vector<4x422xf32> to vector<4x384xf32>
    %7 = vector.extract_strided_slice %3 {offsets = [0, 0], sizes = [32, 4], strides = [1, 1]} : vector<32x37xf32> to vector<32x4xf32>
    %cst_6 = arith.constant dense<0.000000e+00> : vector<32x384xf32>
    %8 = tpu.matmul %7, %6, %cst_6 {dimension_numbers = #tpu.dot_dimension_numbers<[1], [0], [0], [1], [0, 0, 1, 1], [], []>} : vector<32x4xf32>, vector<4x384xf32>, vector<32x384xf32> -> vector<32x384xf32>
    %9 = arith.addf %5, %8 : vector<32x384xf32>
    %10 = vector.extract_strided_slice %2 {offsets = [0, 1], sizes = [4, 384], strides = [1, 1]} : vector<4x422xf32> to vector<4x384xf32>
    %11 = vector.extract_strided_slice %3 {offsets = [0, 4], sizes = [32, 4], strides = [1, 1]} : vector<32x37xf32> to vector<32x4xf32>
    %cst_7 = arith.constant dense<0.000000e+00> : vector<32x384xf32>
    %12 = tpu.matmul %11, %10, %cst_7 {dimension_numbers = #tpu.dot_dimension_numbers<[1], [0], [0], [1], [0, 0, 1, 1], [], []>} : vector<32x4xf32>, vector<4x384xf32>, vector<32x384xf32> -> vector<32x384xf32>
    %13 = arith.addf %9, %12 : vector<32x384xf32>
    %14 = vector.extract_strided_slice %2 {offsets = [0, 2], sizes = [4, 384], strides = [1, 1]} : vector<4x422xf32> to vector<4x384xf32>
    %15 = vector.extract_strided_slice %3 {offsets = [0, 8], sizes = [32, 4], strides = [1, 1]} : vector<32x37xf32> to vector<32x4xf32>
    %cst_8 = arith.constant dense<0.000000e+00> : vector<32x384xf32>
    %16 = tpu.matmul %15, %14, %cst_8 {dimension_numbers = #tpu.dot_dimension_numbers<[1], [0], [0], [1], [0, 0, 1, 1], [], []>} : vector<32x4xf32>, vector<4x384xf32>, vector<32x384xf32> -> vector<32x384xf32>
    %17 = arith.addf %13, %16 : vector<32x384xf32>
    %18 = vector.extract_strided_slice %2 {offsets = [0, 18], sizes = [4, 384], strides = [1, 1]} : vector<4x422xf32> to vector<4x384xf32>
    %19 = vector.extract_strided_slice %3 {offsets = [0, 12], sizes = [32, 4], strides = [1, 1]} : vector<32x37xf32> to vector<32x4xf32>
    %cst_9 = arith.constant dense<0.000000e+00> : vector<32x384xf32>
    %20 = tpu.matmul %19, %18, %cst_9 {dimension_numbers = #tpu.dot_dimension_numbers<[1], [0], [0], [1], [0, 0, 1, 1], [], []>} : vector<32x4xf32>, vector<4x384xf32>, vector<32x384xf32> -> vector<32x384xf32>
    %21 = arith.addf %17, %20 : vector<32x384xf32>
    %22 = vector.extract_strided_slice %2 {offsets = [0, 19], sizes = [4, 384], strides = [1, 1]} : vector<4x422xf32> to vector<4x384xf32>
    %23 = vector.extract_strided_slice %3 {offsets = [0, 16], sizes = [32, 4], strides = [1, 1]} : vector<32x37xf32> to vector<32x4xf32>
    %cst_10 = arith.constant dense<0.000000e+00> : vector<32x384xf32>
    %24 = tpu.matmul %23, %22, %cst_10 {dimension_numbers = #tpu.dot_dimension_numbers<[1], [0], [0], [1], [0, 0, 1, 1], [], []>} : vector<32x4xf32>, vector<4x384xf32>, vector<32x384xf32> -> vector<32x384xf32>
    %25 = arith.addf %21, %24 : vector<32x384xf32>
    %26 = vector.extract_strided_slice %2 {offsets = [0, 20], sizes = [4, 384], strides = [1, 1]} : vector<4x422xf32> to vector<4x384xf32>
    %27 = vector.extract_strided_slice %3 {offsets = [0, 20], sizes = [32, 4], strides = [1, 1]} : vector<32x37xf32> to vector<32x4xf32>
    %cst_11 = arith.constant dense<0.000000e+00> : vector<32x384xf32>
    %28 = tpu.matmul %27, %26, %cst_11 {dimension_numbers = #tpu.dot_dimension_numbers<[1], [0], [0], [1], [0, 0, 1, 1], [], []>} : vector<32x4xf32>, vector<4x384xf32>, vector<32x384xf32> -> vector<32x384xf32>
    %29 = arith.addf %25, %28 : vector<32x384xf32>
    %30 = vector.extract_strided_slice %2 {offsets = [0, 36], sizes = [4, 384], strides = [1, 1]} : vector<4x422xf32> to vector<4x384xf32>
    %31 = vector.extract_strided_slice %3 {offsets = [0, 24], sizes = [32, 4], strides = [1, 1]} : vector<32x37xf32> to vector<32x4xf32>
    %cst_12 = arith.constant dense<0.000000e+00> : vector<32x384xf32>
    %32 = tpu.matmul %31, %30, %cst_12 {dimension_numbers = #tpu.dot_dimension_numbers<[1], [0], [0], [1], [0, 0, 1, 1], [], []>} : vector<32x4xf32>, vector<4x384xf32>, vector<32x384xf32> -> vector<32x384xf32>
    %33 = arith.addf %29, %32 : vector<32x384xf32>
    %34 = vector.extract_strided_slice %2 {offsets = [0, 37], sizes = [4, 384], strides = [1, 1]} : vector<4x422xf32> to vector<4x384xf32>
    %35 = vector.extract_strided_slice %3 {offsets = [0, 28], sizes = [32, 4], strides = [1, 1]} : vector<32x37xf32> to vector<32x4xf32>
    %cst_13 = arith.constant dense<0.000000e+00> : vector<32x384xf32>
    %36 = tpu.matmul %35, %34, %cst_13 {dimension_numbers = #tpu.dot_dimension_numbers<[1], [0], [0], [1], [0, 0, 1, 1], [], []>} : vector<32x4xf32>, vector<4x384xf32>, vector<32x384xf32> -> vector<32x384xf32>
    %37 = arith.addf %33, %36 : vector<32x384xf32>
    %38 = vector.extract_strided_slice %2 {offsets = [0, 38], sizes = [4, 384], strides = [1, 1]} : vector<4x422xf32> to vector<4x384xf32>
    %39 = vector.extract_strided_slice %3 {offsets = [0, 32], sizes = [32, 4], strides = [1, 1]} : vector<32x37xf32> to vector<32x4xf32>
    %cst_14 = arith.constant dense<0.000000e+00> : vector<32x384xf32>
    %40 = tpu.matmul %39, %38, %cst_14 {dimension_numbers = #tpu.dot_dimension_numbers<[1], [0], [0], [1], [0, 0, 1, 1], [], []>} : vector<32x4xf32>, vector<4x384xf32>, vector<32x384xf32> -> vector<32x384xf32>
    %41 = arith.addf %37, %40 : vector<32x384xf32>
    %42 = vector.extract_strided_slice %3 {offsets = [0, 36], sizes = [32, 1], strides = [1, 1]} : vector<32x37xf32> to vector<32x1xf32>
    %43 = vector.broadcast %42 : vector<32x1xf32> to vector<32x384xf32>
    %44 = arith.addf %41, %43 : vector<32x384xf32>
    %cst_15 = arith.constant 0.000000e+00 : f32
    %45 = vector.broadcast %cst_15 : f32 to vector<32x384xf32>
    %46 = arith.maximumf %44, %45 : vector<32x384xf32>
    %47 = vector.extract_strided_slice %4 {offsets = [0, 0], sizes = [1, 32], strides = [1, 1]} : vector<1x33xf32> to vector<1x32xf32>
    %cst_16 = arith.constant dense<0.000000e+00> : vector<1x384xf32>
    %48 = tpu.matmul %47, %46, %cst_16 {dimension_numbers = #tpu.dot_dimension_numbers<[1], [0], [0], [1], [0, 0, 1, 1], [], []>} : vector<1x32xf32>, vector<32x384xf32>, vector<1x384xf32> -> vector<1x384xf32>
    %49 = vector.extract_strided_slice %4 {offsets = [0, 32], sizes = [1, 1], strides = [1, 1]} : vector<1x33xf32> to vector<1x1xf32>
    %50 = vector.broadcast %49 : vector<1x1xf32> to vector<1x384xf32>
    %51 = arith.addf %48, %50 : vector<1x384xf32>
    %52 = arith.negf %51 : vector<1x384xf32>
    %53 = math.exp %52 : vector<1x384xf32>
    %cst_17 = arith.constant 1.000000e+00 : f32
    %54 = vector.broadcast %cst_17 : f32 to vector<1x384xf32>
    %55 = arith.addf %54, %53 : vector<1x384xf32>
    %56 = arith.divf %54, %55 : vector<1x384xf32>
    %57 = vector.extract_strided_slice %2 {offsets = [0, 19], sizes = [4, 384], strides = [1, 1]} : vector<4x422xf32> to vector<4x384xf32>
    %cst_18 = arith.constant dense<0.000000e+00> : vector<384xf32>
    %58 = vector.multi_reduction <add>, %57, %cst_18 [0] : vector<4x384xf32> to vector<384xf32>
    %59 = vector.shape_cast %58 : vector<384xf32> to vector<1x384xf32>
    %cst_19 = arith.constant 4.000000e+00 : f32
    %60 = vector.broadcast %cst_19 : f32 to vector<1x384xf32>
    %61 = arith.divf %59, %60 : vector<1x384xf32>
    %cst_20 = arith.constant 1.000000e-01 : f32
    %62 = vector.broadcast %cst_20 : f32 to vector<1x384xf32>
    %63 = arith.mulf %62, %61 : vector<1x384xf32>
    %64 = arith.addf %56, %63 : vector<1x384xf32>
    %cst_21 = arith.constant 2.000000e+00 : f32
    %65 = vector.broadcast %cst_21 : f32 to vector<1x384xf32>
    %66 = arith.mulf %65, %56 : vector<1x384xf32>
    %cst_22 = arith.constant 1.000000e+00 : f32
    %67 = vector.broadcast %cst_22 : f32 to vector<1x384xf32>
    %68 = arith.subf %66, %67 : vector<1x384xf32>
    %69 = arith.negf %68 : vector<1x384xf32>
    %70 = math.exp %69 : vector<1x384xf32>
    %cst_23 = arith.constant 1.000000e+00 : f32
    %71 = vector.broadcast %cst_23 : f32 to vector<1x384xf32>
    %72 = arith.addf %71, %70 : vector<1x384xf32>
    %73 = arith.divf %71, %72 : vector<1x384xf32>
    %cst_24 = arith.constant 1.100000e+00 : f32
    %74 = vector.broadcast %cst_24 : f32 to vector<1x384xf32>
    %75 = arith.mulf %74, %73 : vector<1x384xf32>
    %76 = arith.subf %75, %64 : vector<1x384xf32>
    %cst_25 = arith.constant 5.000000e-01 : f32
    %77 = vector.broadcast %cst_25 : f32 to vector<1x384xf32>
    %78 = arith.mulf %77, %76 : vector<1x384xf32>
    %79 = arith.subf %68, %78 : vector<1x384xf32>
    %80 = arith.negf %79 : vector<1x384xf32>
    %81 = math.exp %80 : vector<1x384xf32>
    %cst_26 = arith.constant 1.000000e+00 : f32
    %82 = vector.broadcast %cst_26 : f32 to vector<1x384xf32>
    %83 = arith.addf %82, %81 : vector<1x384xf32>
    %84 = arith.divf %82, %83 : vector<1x384xf32>
    %cst_27 = arith.constant 1.100000e+00 : f32
    %85 = vector.broadcast %cst_27 : f32 to vector<1x384xf32>
    %86 = arith.mulf %85, %84 : vector<1x384xf32>
    %87 = arith.subf %86, %64 : vector<1x384xf32>
    %cst_28 = arith.constant 5.000000e-01 : f32
    %88 = vector.broadcast %cst_28 : f32 to vector<1x384xf32>
    %89 = arith.mulf %88, %87 : vector<1x384xf32>
    %90 = arith.subf %79, %89 : vector<1x384xf32>
    %91 = arith.negf %90 : vector<1x384xf32>
    %92 = math.exp %91 : vector<1x384xf32>
    %cst_29 = arith.constant 1.000000e+00 : f32
    %93 = vector.broadcast %cst_29 : f32 to vector<1x384xf32>
    %94 = arith.addf %93, %92 : vector<1x384xf32>
    %95 = arith.divf %93, %94 : vector<1x384xf32>
    %cst_30 = arith.constant 1.100000e+00 : f32
    %96 = vector.broadcast %cst_30 : f32 to vector<1x384xf32>
    %97 = arith.mulf %96, %95 : vector<1x384xf32>
    %98 = arith.subf %97, %64 : vector<1x384xf32>
    %cst_31 = arith.constant 5.000000e-01 : f32
    %99 = vector.broadcast %cst_31 : f32 to vector<1x384xf32>
    %100 = arith.mulf %99, %98 : vector<1x384xf32>
    %101 = arith.subf %90, %100 : vector<1x384xf32>
    %102 = arith.negf %101 : vector<1x384xf32>
    %103 = math.exp %102 : vector<1x384xf32>
    %cst_32 = arith.constant 1.000000e+00 : f32
    %104 = vector.broadcast %cst_32 : f32 to vector<1x384xf32>
    %105 = arith.addf %104, %103 : vector<1x384xf32>
    %106 = arith.divf %104, %105 : vector<1x384xf32>
    %c0_33 = arith.constant 0 : index
    %c0_34 = arith.constant 0 : index
    %107 = vector.load %arg4[%c0_33, %c0_34] : memref<2x384xf32, #tpu.memory_space<vmem>>, vector<1x384xf32>
    tpu.vector_store %arg4[%c0_33, %c0_34], %56 {strides = array<i32>} : memref<2x384xf32, #tpu.memory_space<vmem>>, vector<1x384xf32>,
    %c1 = arith.constant 1 : index
    %c0_35 = arith.constant 0 : index
    %108 = vector.load %arg4[%c1, %c0_35] : memref<2x384xf32, #tpu.memory_space<vmem>>, vector<1x384xf32>
    tpu.vector_store %arg4[%c1, %c0_35], %106 {strides = array<i32>} : memref<2x384xf32, #tpu.memory_space<vmem>>, vector<1x384xf32>,
    return
  }
  func.func @transform_0(%arg0: i32) -> (i32, i32, i32) {
    %c0_i32 = arith.constant 0 : i32
    %c0_i32_0 = arith.constant 0 : i32
    %c0_i32_1 = arith.constant 0 : i32
    return %arg0, %c0_i32, %c0_i32_0 : i32, i32, i32
  }
  func.func @transform_1(%arg0: i32) -> (i32, i32) {
    %c0_i32 = arith.constant 0 : i32
    %c0_i32_0 = arith.constant 0 : i32
    %c0_i32_1 = arith.constant 0 : i32
    return %c0_i32, %c0_i32_0 : i32, i32
  }
  func.func @transform_2(%arg0: i32) -> (i32, i32) {
    %c0_i32 = arith.constant 0 : i32
    %c0_i32_0 = arith.constant 0 : i32
    %c0_i32_1 = arith.constant 0 : i32
    return %c0_i32, %c0_i32_0 : i32, i32
  }
  func.func @transform_3(%arg0: i32) -> (i32, i32) {
    %c0_i32 = arith.constant 0 : i32
    %c0_i32_0 = arith.constant 0 : i32
    return %c0_i32, %arg0 : i32, i32
  }
}

</mosaic_0001>

<bundles_post_ra>
// kernel: carts_base_forward.1
= control target key start
LH: loop header
LB: loop body
LE: loop exit
PB: predicated region body
PF: predicated region fallthrough
CT: control target
= control target key end

     0   :  { %s3110_s12 = smov 0   ;;  %s3659_s0 = inlined_call_operand.vmem [shape: bf16[2,4,422], index: 0, kind: input, shape index: {}]   ;;  %s3660_s1 = inlined_call_operand.vmem [shape: f32[32,37], index: 1, kind: input, shape index: {}]   ;;  %s3661_s2 = inlined_call_operand.vmem [shape: f32[1,33], index: 2, kind: input, shape index: {}]   ;;  %s3662_s3 = inlined_call_operand.vmem [shape: f32[2,768], index: 3, kind: output, shape index: {}]  }
   0x1 LB: > { %s3116_s13 = sadd.s32 4294967295, %s3068_s12   ;;  %p2634_p0 = scmp.ge.s32.totalorder %s3068_s12, 1  ;;  %s3068_s12 = sphi %s3110_s12, %s13_s12  }
   0x2   : > { %p137_p1 = scmp.lt.s32.totalorder %s3068_s12, 3 }
   0x4   : > { %p138_p2 = pnand %p2634_p0, %p137_p1 }
   0x6   : > { %141 = sbr.rel (%p138_p2) target bundleno = 854 (0x356), region = 32 }
   0xb   : > { %p161_p3 = scmp.lt.s32.totalorder %s3116_s13, 1  ;;  %v3124_v0 = vld [vmem:[%s3660_s1] sm:$0xff]  ;;  %s3070_s17 = smov 124   ;;  %v3131_v1 = vld [vmem:[%s3660_s1 + $0x8] sm:$0xff]  ;;  %v3663_v2 = vmov 0.0   ;;  %v3146_v6 = vld [vmem:[%s3660_s1 + $0x10] sm:$0xff] }
   0xc   : > { %184 = vrot.lane.b32.xlu1 %v3124_v0, %s3070_s17  ;;  %288 = vmatprep.mubr.f32.mxu0 %v3663_v2  ;;  %s3072_s26 = smov 127   ;;  %s3073_s27 = smov 126   ;;  %v3164_v11 = vld [vmem:[%s3660_s1 + $0x18] sm:$0xff]  ;;  %v3086_v14 = vmov 36   ;;  %vm204_vm0 = vcmask 1039360   ;;  %vm217_vm1 = vcmask 1043456  }
   0xd   : > { %s162_s16 = scalar_select %p161_p3, %s3116_s13, 1  ;;  %306 = vmatprep.mubr.f32.mxu1 %v3663_v2  ;;  %2999 = vset.pattern.permute.xlu1 %v3086_v14  ;;  %vm208_vm2 = vcmask 31744   ;;  %vm602_vm3 = vcmask 1031168   ;;  %vm822_vm4 = vcmask 900096   ;;  %vm1042_vm5 = vcmask 891904  }
   0xe   : > { %s3074_s30 = smov 120   ;;  %s3075_s4 = smov 116   ;;  %3000 = vset.pattern.permute.xlu0 %v3086_v14  ;;  %vm1262_vm6 = vcmask 883712   ;;  %vm1482_vm7 = vcmask 752640   ;;  %vm1702_vm8 = vcmask 744448   ;;  %vm1922_vm9 = vcmask 736256  }
   0xf   : > { %s2760_s20 = sshll.u32 %s162_s16, 3  ;;  %s3076_s5 = smov 110   ;;  %vm3087_vm10 = vmmov 0   ;;  %vm2339_vm11 = vcmask 1043608   ;;  %vm2361_vm12 = vcmask 150528   ;;  %vm2175_vm13 = vcmask 261120  }
  0x10   : > { %s165_s23 = scalar_lea.vmem %s3659_s0, %s2760_s20  ;;  %186 = vrot.lane.b32.xlu1 %v3131_v1, %s3070_s17  ;;  %s3077_s6 = smov 109  }
  0x11   : > { %v172_v3 = vld [vmem:[%s165_s23] sm:$0xff]  ;;  %s3078_s7 = smov 112   ;;  %s3079_s8 = smov 108  }
  0x12   : > { %v3139_v4 = vunpack.c.l.bf16 %v172_v3  ;;  %v3141_v5 = vunpack.c.h.bf16 %v172_v3  ;;  %s3080_s9 = smov 92   ;;  %s3081_s10 = smov 104  }
  0x13   : > { %s3082_s11 = smov 100   ;;  %s3083_s14 = smov 91  }
  0x14   : > { %v3150_v7 = vcombine.high %v3139_v4, %v3139_v4  ;;  %v3154_v8 = vcombine.high %v3141_v5, %v3141_v5  ;;  %188 = vrot.lane.b32.xlu1 %v3146_v6, %s3070_s17  ;;  %s3084_s15 = smov 90   ;;  %s3085_s16 = smov 96  }
  0x15   : > { %s166_s19 = smul.u32 3, %s3116_s13 }
  0x16   : > { %v2924_v9 = vpack.i.bf16 %v3141_v5, %v3150_v7  ;;  %v2939_v10 = vpack.i.bf16 %v3154_v8, %v3139_v4  ;;  %v2944_v12 = vpack.i.bf16 %v3154_v8, %v3141_v5  ;;  %v2949_v13 = vpack.i.bf16 %v3139_v4, %v3150_v7 }
  0x17   : > { %p167_p4 = scmp.lt.s32.totalorder %s166_s19, 5 }
  0x18   : > { %2925 = vrot.lane.b32.xlu0 %v2924_v9, %s3072_s26  ;;  %2940 = vrot.lane.b32.xlu1 %v2939_v10, %s3073_s27 }
  0x19   : > { %s3705_s19 = smov (!%p167_p4, %s166_s19), 5 }
  0x1a   : > { %s2637_s13 = sshll.u32 %s3705_s19, 1 }
  0x1b   : > { %s3626_s22 = scalar_lea.vmem %s3662_s3, %s2637_s13 }
  0x1c   : > { %2930 = vrot.lane.b32.xlu0 %v2939_v10, %s3072_s26  ;;  %588 = vrot.lane.b32.xlu1 %v3131_v1, %s3074_s30 }
  0x20   : > { %190 = vrot.lane.b32.xlu0 %v3164_v11, %s3070_s17  ;;  %592 = vrot.lane.b32.xlu1 %v3164_v11, %s3074_s30 }
  0x24   : > { %2935 = vrot.lane.b32.xlu0 %v2924_v9, %s3073_s27  ;;  %806 = vrot.lane.b32.xlu1 %v3124_v0, %s3075_s4 }
  0x28   : > { %586 = vrot.lane.b32.xlu0 %v3124_v0, %s3074_s30  ;;  %810 = vrot.lane.b32.xlu1 %v3146_v6, %s3075_s4 }
  0x2c   : > { %590 = vrot.lane.b32.xlu0 %v3146_v6, %s3074_s30  ;;  %812 = vrot.lane.b32.xlu1 %v3164_v11, %s3075_s4 }
  0x30   : > { %2945 = vrot.lane.b32.xlu0 %v2944_v12, %s3076_s5  ;;  %2960 = vrot.lane.b32.xlu1 %v2939_v10, %s3077_s6 }
  0x34   : > { %808 = vrot.lane.b32.xlu0 %v3131_v1, %s3075_s4  ;;  %1028 = vrot.lane.b32.xlu1 %v3131_v1, %s3078_s7 }
  0x38   : > { %2950 = vrot.lane.b32.xlu0 %v2949_v13, %s3076_s5  ;;  %1032 = vrot.lane.b32.xlu1 %v3164_v11, %s3078_s7 }
  0x3c   : > { %2955 = vrot.lane.b32.xlu0 %v2924_v9, %s3077_s6  ;;  %1246 = vrot.lane.b32.xlu1 %v3124_v0, %s3079_s8 }
  0x40   : > { %1026 = vrot.lane.b32.xlu0 %v3124_v0, %s3078_s7  ;;  %1250 = vrot.lane.b32.xlu1 %v3146_v6, %s3079_s8 }
  0x44   : > { %1030 = vrot.lane.b32.xlu0 %v3146_v6, %s3078_s7  ;;  %1252 = vrot.lane.b32.xlu1 %v3164_v11, %s3079_s8 }
  0x48   : > { %2965 = vrot.lane.b32.xlu0 %v2944_v12, %s3079_s8  ;;  %2980 = vrot.lane.b32.xlu1 %v2939_v10, %s3080_s9 }
  0x4c   : > { %1248 = vrot.lane.b32.xlu0 %v3131_v1, %s3079_s8  ;;  %1468 = vrot.lane.b32.xlu1 %v3131_v1, %s3081_s10 }
  0x50   : > { %2970 = vrot.lane.b32.xlu0 %v2949_v13, %s3079_s8  ;;  %1472 = vrot.lane.b32.xlu1 %v3164_v11, %s3081_s10 }
  0x54   : > { %2975 = vrot.lane.b32.xlu0 %v2924_v9, %s3080_s9  ;;  %1686 = vrot.lane.b32.xlu1 %v3124_v0, %s3082_s11 }
  0x58   : > { %1466 = vrot.lane.b32.xlu0 %v3124_v0, %s3081_s10  ;;  %1690 = vrot.lane.b32.xlu1 %v3146_v6, %s3082_s11 }
  0x5c   : > { %1470 = vrot.lane.b32.xlu0 %v3146_v6, %s3081_s10  ;;  %1692 = vrot.lane.b32.xlu1 %v3164_v11, %s3082_s11 }
  0x60   : > { %2985 = vrot.lane.b32.xlu0 %v2944_v12, %s3083_s14  ;;  %1914 = vrot.lane.b32.xlu1 %v3139_v4, %s3084_s15 }
  0x64   : > { %1688 = vrot.lane.b32.xlu0 %v3131_v1, %s3082_s11  ;;  %1908 = vrot.lane.b32.xlu1 %v3131_v1, %s3085_s16 }
  0x68   : > { %2990 = vrot.lane.b32.xlu0 %v2949_v13, %s3083_s14  ;;  %1912 = vrot.lane.b32.xlu1 %v3164_v11, %s3085_s16 }
  0x6c   : > { %2995 = vrot.lane.b32.xlu0 %v2924_v9, %s3084_s15  ;;  %2139 = vperm.xlu1 %2999, %v3164_v11  }
  0x70   : > { %1906 = vrot.lane.b32.xlu0 %v3124_v0, %s3085_s16  ;;  %2131 = vperm.xlu1 %2999, %v3131_v1  }
  0x74   : > { %1910 = vrot.lane.b32.xlu0 %v3146_v6, %s3085_s16  ;;  %2127 = vperm.xlu1 %2999, %v3124_v0  }
  0x78   : > { %1920 = vrot.lane.b32.xlu0 %v3154_v8, %s3084_s15 }
  0x7c   : > { %2135 = vperm.xlu0 %3000, %v3146_v6  }
  0x7e   : > { %v185_v15 = vpop.permute.xlu1 %184 }
  0x82   : > { %v187_v16 = vpop.permute.xlu1 %186 }
  0x86   : > { %v189_v17 = vpop.permute.xlu1 %188 }
  0x8a   : > { %v2926_v18 = vpop.permute.xlu0 %2925  ;;  %v2941_v21 = vpop.permute.xlu1 %2940 }
  0x8b   : > { %v2928_v19 = vunpack.i.h.bf16 %v2926_v18  ;;  %v2927_v20 = vunpack.i.l.bf16 %v2926_v18  ;;  %v2943_v31 = vunpack.i.h.bf16 %v2941_v21  ;;  %v2942_v36 = vunpack.i.l.bf16 %v2941_v21 }
  0x8d   : > { %v206_v22 = vsel %vm204_vm0, %v2927_v20, %v2928_v19 }
  0x8e   : > { %v2931_v23 = vpop.permute.xlu0 %2930  ;;  %2638 = vmatprep.subr.msk.mxu0 %vm217_vm1, %v206_v22  ;;  %2894 = vmatprep.subr.msk.mxu1 %vm217_vm1, %v206_v22  ;;  %v3209_v26 = vpop.permute.xlu1 %588 }
  0x8f   : > { %v2933_v24 = vunpack.i.h.bf16 %v2931_v23  ;;  %v2932_v25 = vunpack.i.l.bf16 %v2931_v23 }
  0x91   : > { %v205_v27 = vsel %vm204_vm0, %v2932_v25, %v2927_v20  ;;  %v207_v28 = vsel %vm204_vm0, %v2928_v19, %v2933_v24 }
  0x92   : > { %v191_v29 = vpop.permute.xlu0 %190  ;;  %2639 = vmatpush1.msk.msra.mxu0 %vm217_vm1, %v205_v27  ;;  %2895 = vmatpush1.msk.msra.mxu1 %vm217_vm1, %v205_v27  ;;  %v3215_v30 = vpop.permute.xlu1 %592 }
  0x93   : > { %2640 = vmatmul.mubr.msk.f32.vlgmr.msra.gmra.mxu0 %vm208_vm2, %v185_v15  ;;  %2643 = vmatmul.mubr.msk.f32.vlgmr.msra.gmra.mxu1 %vm208_vm2, %v191_v29 }
  0x94   : > { %2811 = vmatprep.subr.msk.mxu1 %vm217_vm1, %v207_v28  ;;  %2813 = vmatprep.mubr.msk.f32.mxu1 %vm208_vm2, %v185_v15 }
  0x95   : > { %2812 = vmatpush3.msk.msra.mxu1 %vm217_vm1, %v207_v28  ;;  %2819 = vmatprep.subr.msk.mxu0 %vm217_vm1, %v3141_v5 }
  0x96   : > { %2820 = vmatpush3.msk.msra.mxu0 %vm217_vm1, %v3141_v5  ;;  %v2936_v32 = vpop.permute.xlu0 %2935  ;;  %294 = vmatprep.mubr.f32.mxu0 %v3663_v2  ;;  %v3227_v35 = vpop.permute.xlu1 %806 }
  0x97   : > { %v2938_v33 = vunpack.i.h.bf16 %v2936_v32  ;;  %v2937_v34 = vunpack.i.l.bf16 %v2936_v32  ;;  %2641 = vmatmul.mubr.msk.f32.gmra.mxu0 %vm208_vm2, %v187_v16  ;;  %2814 = vmatmul.mubr.msk.f32.vlgmr.msra.gmra.mxu1 %vm208_vm2, %v187_v16 }
  0x98   : > { %300 = vmatprep.mubr.f32.mxu0 %v3663_v2  ;;  %2816 = vmatprep.mubr.msk.f32.mxu1 %vm208_vm2, %v189_v17 }
  0x99   : > { %2649 = vmatprep.subr.msk.mxu1 %vm217_vm1, %v3150_v7  ;;  %v604_v37 = vsel %vm602_vm3, %v2937_v34, %v2938_v33  ;;  %v605_v38 = vsel %vm602_vm3, %v2938_v33, %v2943_v31  ;;  %v603_v41 = vsel %vm602_vm3, %v2942_v36, %v2937_v34 }
  0x9a   : > { %v587_v39 = vpop.permute.xlu0 %586  ;;  %2650 = vmatpush1.msk.msra.mxu1 %vm217_vm1, %v3139_v4  ;;  %2660 = vmatprep.subr.msk.mxu0 %vm217_vm1, %v604_v37  ;;  %v3240_v40 = vpop.permute.xlu1 %810 }
  0x9b   : > { %2642 = vmatmul.mubr.msk.f32.gmra.mxu0 %vm208_vm2, %v189_v17  ;;  %2817 = vmatmul.mubr.msk.f32.gmra.mxu1 %vm208_vm2, %v191_v29 }
  0x9c   : > { %2827 = vmatprep.subr.msk.mxu1 %vm217_vm1, %v605_v38  ;;  %476 = vmatprep.mubr.f32.mxu1 %v3663_v2 }
  0x9d   : > { %2821 = vmatprep.mubr.msk.f32.mxu0 %vm208_vm2, %v3124_v0 }
  0x9e   : > { %v591_v42 = vpop.permute.xlu0 %590  ;;  %v3251_v43 = vpop.permute.xlu1 %812 }
  0x9f   : > { %2651 = vmatmul.mubr.msk.f32.vlgmr.msra.gmra.mxu1 %vm208_vm2, %v3124_v0  ;;  %2822 = vmatmul.mubr.msk.f32.vlgmr.msra.gmra.mxu0 %vm208_vm2, %v3131_v1 }
  0xa0   : > { %2661 = vmatpush1.msk.msra.mxu0 %vm217_vm1, %v603_v41  ;;  %2828 = vmatpush3.msk.msra.mxu1 %vm217_vm1, %v605_v38 }
  0xa1   : > { %482 = vmatprep.mubr.f32.mxu1 %v3663_v2  ;;  %2824 = vmatprep.mubr.msk.f32.mxu0 %vm208_vm2, %v3146_v6 }
  0xa2   : > { %v2946_v44 = vpop.permute.xlu0 %2945  ;;  %v2961_v47 = vpop.permute.xlu1 %2960 }
  0xa3   : > { %v2948_v45 = vunpack.i.h.bf16 %v2946_v44  ;;  %v2947_v46 = vunpack.i.l.bf16 %v2946_v44  ;;  %2652 = vmatmul.mubr.msk.f32.gmra.mxu1 %vm208_vm2, %v3131_v1  ;;  %2825 = vmatmul.mubr.msk.f32.gmra.mxu0 %vm208_vm2, %v3164_v11  ;;  %v2963_v56 = vunpack.i.h.bf16 %v2961_v47  ;;  %v2962_v62 = vunpack.i.l.bf16 %v2961_v47 }
  0xa4   : > { %488 = vmatprep.mubr.f32.mxu1 %v3663_v2  ;;  %684 = vmatprep.mubr.f32.mxu0 %v3663_v2 }
  0xa5   : > { %v825_v48 = vsel %vm822_vm4, %v2947_v46, %v2948_v45 }
  0xa6   : > { %v809_v49 = vpop.permute.xlu0 %808  ;;  %2835 = vmatprep.subr.msk.mxu0 %vm217_vm1, %v825_v48  ;;  %v3269_v50 = vpop.permute.xlu1 %1028 }
  0xa7   : > { %2653 = vmatmul.mubr.msk.f32.gmra.mxu1 %vm208_vm2, %v3146_v6  ;;  %2662 = vmatmul.mubr.msk.f32.vlgmr.msra.gmra.mxu0 %vm208_vm2, %v587_v39 }
  0xa8   : > { %2836 = vmatpush3.msk.msra.mxu0 %vm217_vm1, %v825_v48  ;;  %494 = vmatprep.mubr.f32.mxu1 %v3663_v2 }
  0xa9   : > { %690 = vmatprep.mubr.f32.mxu0 %v3663_v2 }
  0xaa   : > { %v2951_v51 = vpop.permute.xlu0 %2950  ;;  %v3278_v54 = vpop.permute.xlu1 %1032 }
  0xab   : > { %v2953_v52 = vunpack.i.h.bf16 %v2951_v51  ;;  %v2952_v53 = vunpack.i.l.bf16 %v2951_v51  ;;  %2654 = vmatmul.mubr.msk.f32.gmra.mxu1 %vm208_vm2, %v3164_v11  ;;  %2663 = vmatmul.mubr.msk.f32.gmra.mxu0 %vm208_vm2, %v3209_v26 }
  0xac   : > { %2829 = vmatprep.mubr.msk.f32.mxu1 %vm208_vm2, %v587_v39  ;;  %696 = vmatprep.mubr.f32.mxu0 %v3663_v2 }
  0xad   : > { %v824_v55 = vsel %vm822_vm4, %v2952_v53, %v2947_v46  ;;  %v823_v57 = vsel %vm822_vm4, %v2953_v52, %v2952_v53 }
  0xae   : > { %v2956_v58 = vpop.permute.xlu0 %2955  ;;  %2671 = vmatprep.subr.msk.mxu1 %vm217_vm1, %v824_v55  ;;  %v3288_v61 = vpop.permute.xlu1 %1246 }
  0xaf   : > { %v2958_v59 = vunpack.i.h.bf16 %v2956_v58  ;;  %v2957_v60 = vunpack.i.l.bf16 %v2956_v58  ;;  %2664 = vmatmul.mubr.msk.f32.gmra.mxu0 %vm208_vm2, %v591_v42  ;;  %2830 = vmatmul.mubr.msk.f32.vlgmr.msra.gmra.mxu1 %vm208_vm2, %v3209_v26 }
  0xb0   : > { %2832 = vmatprep.mubr.msk.f32.mxu1 %vm208_vm2, %v591_v42  ;;  %2672 = vmatpush1.msk.msra.mxu1 %vm217_vm1, %v823_v57 }
  0xb1   : > { %702 = vmatprep.mubr.f32.mxu0 %v3663_v2  ;;  %v1044_v63 = vsel %vm1042_vm5, %v2957_v60, %v2958_v59  ;;  %v1045_v0 = vsel %vm1042_vm5, %v2958_v59, %v2963_v56  ;;  %v1043_v6 = vsel %vm1042_vm5, %v2962_v62, %v2957_v60  ;;  %v2347_v59 = vsel %vm217_vm1, %v3150_v7, 0.0 }
  0xb2   : > { %v1027_v1 = vpop.permute.xlu0 %1026  ;;  %2682 = vmatprep.subr.msk.mxu0 %vm217_vm1, %v1044_v63  ;;  %2843 = vmatprep.subr.msk.mxu1 %vm217_vm1, %v1045_v0  ;;  %v3304_v3 = vpop.permute.xlu1 %1250  ;;  %v2354_v60 = vsel %vm217_vm1, %v3141_v5, 0.0  ;;  %v3088_v62 = vmov 32   ;;  %v2340_v63 = vsel %vm2339_vm11, %v3139_v4, 0.0  ;;  %v2362_v7 = vsel %vm2361_vm12, %v3154_v8, 0.0 }
  0xb3   : > { %2665 = vmatmul.mubr.msk.f32.gmra.mxu0 %vm208_vm2, %v3215_v30  ;;  %2833 = vmatmul.mubr.msk.f32.gmra.mxu1 %vm208_vm2, %v3215_v30  ;;  %v2363_v5 = vrot.slane %v2362_v7, 4 }
  0xb4   : > { %2837 = vmatprep.mubr.msk.f32.mxu0 %vm208_vm2, %v3227_v35  ;;  %904 = vmatprep.mubr.f32.mxu1 %v3663_v2 }
  0xb5   : > { %3001 = vset.pattern.permute.xlu0 %v3088_v62 }
  0xb6   : > { %v1031_v9 = vpop.permute.xlu0 %1030  ;;  %v3315_v11 = vpop.permute.xlu1 %1252 }
  0xb7   : > { %2673 = vmatmul.mubr.msk.f32.vlgmr.msra.gmra.mxu1 %vm208_vm2, %v3227_v35  ;;  %2838 = vmatmul.mubr.msk.f32.vlgmr.msra.gmra.mxu0 %vm208_vm2, %v809_v49 }
  0xb8   : > { %2683 = vmatpush1.msk.msra.mxu0 %vm217_vm1, %v1043_v6  ;;  %2844 = vmatpush3.msk.msra.mxu1 %vm217_vm1, %v1045_v0  ;;  %v2348_v0 = vrot.slane %v2347_v59, 4 }
  0xb9   : > { %2840 = vmatprep.mubr.msk.f32.mxu0 %vm208_vm2, %v3240_v40  ;;  %910 = vmatprep.mubr.f32.mxu1 %v3663_v2 }
  0xba   : > { %v2966_v10 = vpop.permute.xlu0 %2965  ;;  %v2981_v16 = vpop.permute.xlu1 %2980  ;;  %v2349_v6 = vadd.f32 %v2348_v0, %v2347_v59 }
  0xbb   : > { %v2968_v12 = vunpack.i.h.bf16 %v2966_v10  ;;  %v2967_v13 = vunpack.i.l.bf16 %v2966_v10  ;;  %2674 = vmatmul.mubr.msk.f32.gmra.mxu1 %vm208_vm2, %v809_v49  ;;  %2841 = vmatmul.mubr.msk.f32.gmra.mxu0 %vm208_vm2, %v3251_v43  ;;  %v2983_v22 = vunpack.i.h.bf16 %v2981_v16  ;;  %v2982_v27 = vunpack.i.l.bf16 %v2981_v16 }
  0xbc   : > { %916 = vmatprep.mubr.f32.mxu1 %v3663_v2  ;;  %1124 = vmatprep.mubr.f32.mxu0 %v3663_v2 }
  0xbd   : > { %v1265_v14 = vsel %vm1262_vm6, %v2967_v13, %v2968_v12 }
  0xbe   : > { %v1249_v15 = vpop.permute.xlu0 %1248  ;;  %2851 = vmatprep.subr.msk.mxu0 %vm217_vm1, %v1265_v14  ;;  %v3336_v20 = vpop.permute.xlu1 %1468 }
  0xbf   : > { %2675 = vmatmul.mubr.msk.f32.gmra.mxu1 %vm208_vm2, %v3240_v40  ;;  %2684 = vmatmul.mubr.msk.f32.vlgmr.msra.gmra.mxu0 %vm208_vm2, %v1027_v1 }
  0xc0   : > { %2852 = vmatpush3.msk.msra.mxu0 %vm217_vm1, %v1265_v14  ;;  %922 = vmatprep.mubr.f32.mxu1 %v3663_v2 }
  0xc1   : > { %1130 = vmatprep.mubr.f32.mxu0 %v3663_v2 }
  0xc2   : > { %v2971_v17 = vpop.permute.xlu0 %2970  ;;  %v1473_v31 = vpop.permute.xlu1 %1472 }
  0xc3   : > { %v2973_v18 = vunpack.i.h.bf16 %v2971_v17  ;;  %v2972_v19 = vunpack.i.l.bf16 %v2971_v17  ;;  %2676 = vmatmul.mubr.msk.f32.gmra.mxu1 %vm208_vm2, %v3251_v43  ;;  %2685 = vmatmul.mubr.msk.f32.gmra.mxu0 %vm208_vm2, %v3269_v50 }
  0xc4   : > { %2845 = vmatprep.mubr.msk.f32.mxu1 %vm208_vm2, %v1027_v1  ;;  %1136 = vmatprep.mubr.f32.mxu0 %v3663_v2  ;;  %v2355_v1 = vrot.slane %v2354_v60, 4 }
  0xc5   : > { %v1264_v21 = vsel %vm1262_vm6, %v2972_v19, %v2967_v13  ;;  %v1263_v23 = vsel %vm1262_vm6, %v2973_v18, %v2972_v19  ;;  %v2364_v13 = vadd.f32 %v2363_v5, %v2362_v7 }
  0xc6   : > { %v2976_v24 = vpop.permute.xlu0 %2975  ;;  %2693 = vmatprep.subr.msk.mxu1 %vm217_vm1, %v1264_v21  ;;  %v1687_v34 = vpop.permute.xlu1 %1686 }
  0xc7   : > { %v2978_v25 = vunpack.i.h.bf16 %v2976_v24  ;;  %v2977_v26 = vunpack.i.l.bf16 %v2976_v24  ;;  %2686 = vmatmul.mubr.msk.f32.gmra.mxu0 %vm208_vm2, %v1031_v9  ;;  %2846 = vmatmul.mubr.msk.f32.vlgmr.msra.gmra.mxu1 %vm208_vm2, %v3269_v50  ;;  %v2365_v18 = vrot.slane %v2364_v13, 2 }
  0xc8   : > { %2848 = vmatprep.mubr.msk.f32.mxu1 %vm208_vm2, %v1031_v9  ;;  %2694 = vmatpush1.msk.msra.mxu1 %vm217_vm1, %v1263_v23  ;;  %v2356_v9 = vadd.f32 %v2355_v1, %v2354_v60 }
  0xc9   : > { %1142 = vmatprep.mubr.f32.mxu0 %v3663_v2  ;;  %v1484_v28 = vsel %vm1482_vm7, %v2977_v26, %v2978_v25  ;;  %v1485_v29 = vsel %vm1482_vm7, %v2978_v25, %v2983_v22  ;;  %v1483_v32 = vsel %vm1482_vm7, %v2982_v27, %v2977_v26  ;;  %v2366_v24 = vadd.f32 %v2365_v18, %v2364_v13 }
  0xca   : > { %v1467_v30 = vpop.permute.xlu0 %1466  ;;  %2704 = vmatprep.subr.msk.mxu0 %vm217_vm1, %v1484_v28  ;;  %2859 = vmatprep.subr.msk.mxu1 %vm217_vm1, %v1485_v29  ;;  %v1691_v40 = vpop.permute.xlu1 %1690  ;;  %v2357_v12 = vrot.slane %v2356_v9, 2 }
  0xcb   : > { %2687 = vmatmul.mubr.msk.f32.gmra.mxu0 %vm208_vm2, %v3278_v54  ;;  %2849 = vmatmul.mubr.msk.f32.gmra.mxu1 %vm208_vm2, %v3278_v54 }
  0xcc   : > { %2853 = vmatprep.mubr.msk.f32.mxu0 %vm208_vm2, %v3288_v61  ;;  %1344 = vmatprep.mubr.f32.mxu1 %v3663_v2  ;;  %v2358_v4 = vadd.f32 %v2357_v12, %v2356_v9 }
  0xce   : > { %v1471_v33 = vpop.permute.xlu0 %1470  ;;  %v1693_v44 = vpop.permute.xlu1 %1692  ;;  %v2359_v23 = vrot.slane %v2358_v4, 1 }
  0xcf   : > { %2695 = vmatmul.mubr.msk.f32.vlgmr.msra.gmra.mxu1 %vm208_vm2, %v3288_v61  ;;  %2854 = vmatmul.mubr.msk.f32.vlgmr.msra.gmra.mxu0 %vm208_vm2, %v1249_v15  ;;  %v3438_v61 = vld [vmem:[%s3661_s2] sm:$0x1] }
  0xd0   : > { %2705 = vmatpush1.msk.msra.mxu0 %vm217_vm1, %v1483_v32  ;;  %2860 = vmatpush3.msk.msra.mxu1 %vm217_vm1, %v1485_v29  ;;  %3667 = vst [vmem:[#allocation2_spill] sm:$0xff] %v3438_v61  ;;  %v2360_v28 = vadd.f32 %v2359_v23, %v2358_v4  ;;  %v2367_v29 = vrot.slane %v2366_v24, 1 }
  0xd1   : > { %2856 = vmatprep.mubr.msk.f32.mxu0 %vm208_vm2, %v3304_v3  ;;  %1350 = vmatprep.mubr.f32.mxu1 %v3663_v2 }
  0xd2   : > { %v2986_v35 = vpop.permute.xlu0 %2985  ;;  %v1915_v52 = vpop.permute.xlu1 %1914  ;;  %2168 = vperm.xlu0 %3001, %v3438_v61  }
  0xd3   : > { %v2988_v36 = vunpack.i.h.bf16 %v2986_v35  ;;  %v2987_v37 = vunpack.i.l.bf16 %v2986_v35  ;;  %2696 = vmatmul.mubr.msk.f32.gmra.mxu1 %vm208_vm2, %v1249_v15  ;;  %2857 = vmatmul.mubr.msk.f32.gmra.mxu0 %vm208_vm2, %v3315_v11 }
  0xd4   : > { %1356 = vmatprep.mubr.f32.mxu1 %v3663_v2  ;;  %1564 = vmatprep.mubr.f32.mxu0 %v3663_v2 }
  0xd5   : > { %v1705_v38 = vsel %vm1702_vm8, %v2987_v37, %v2988_v36  ;;  %v2368_v36 = vadd.f32 %v2367_v29, %v2366_v24 }
  0xd6   : > { %v1689_v39 = vpop.permute.xlu0 %1688  ;;  %2867 = vmatprep.subr.msk.mxu0 %vm217_vm1, %v1705_v38  ;;  %v1909_v57 = vpop.permute.xlu1 %1908 }
  0xd7   : > { %2697 = vmatmul.mubr.msk.f32.gmra.mxu1 %vm208_vm2, %v3304_v3  ;;  %2706 = vmatmul.mubr.msk.f32.vlgmr.msra.gmra.mxu0 %vm208_vm2, %v1467_v30  ;;  %v2341_v3 = vrot.slane %v2340_v63, 4 }
  0xd8   : > { %2868 = vmatpush3.msk.msra.mxu0 %vm217_vm1, %v1705_v38  ;;  %1362 = vmatprep.mubr.f32.mxu1 %v3663_v2 }
  0xd9   : > { %1570 = vmatprep.mubr.f32.mxu0 %v3663_v2  ;;  %v2342_v10 = vadd.f32 %v2341_v3, %v2340_v63 }
  0xda   : > { %v2991_v41 = vpop.permute.xlu0 %2990  ;;  %v1913_v58 = vpop.permute.xlu1 %1912 }
  0xdb   : > { %v2993_v42 = vunpack.i.h.bf16 %v2991_v41  ;;  %v2992_v43 = vunpack.i.l.bf16 %v2991_v41  ;;  %2698 = vmatmul.mubr.msk.f32.gmra.mxu1 %vm208_vm2, %v3315_v11  ;;  %2707 = vmatmul.mubr.msk.f32.gmra.mxu0 %vm208_vm2, %v3336_v20  ;;  %v2350_v11 = vrot.slane %v2349_v6, 2  ;;  %v2343_v14 = vrot.slane %v2342_v10, 2 }
  0xdc   : > { %2861 = vmatprep.mubr.msk.f32.mxu1 %vm208_vm2, %v1467_v30  ;;  %1576 = vmatprep.mubr.f32.mxu0 %v3663_v2 }
  0xdd   : > { %v1704_v45 = vsel %vm1702_vm8, %v2992_v43, %v2987_v37  ;;  %v1703_v46 = vsel %vm1702_vm8, %v2993_v42, %v2992_v43  ;;  %v2351_v17 = vadd.f32 %v2350_v11, %v2349_v6  ;;  %v2344_v19 = vadd.f32 %v2343_v14, %v2342_v10 }
  0xde   : > { %v2996_v47 = vpop.permute.xlu0 %2995  ;;  %2715 = vmatprep.subr.msk.mxu1 %vm217_vm1, %v1704_v45 }
  0xdf   : > { %v2998_v48 = vunpack.i.h.bf16 %v2996_v47  ;;  %v2997_v49 = vunpack.i.l.bf16 %v2996_v47  ;;  %2708 = vmatmul.mubr.msk.f32.gmra.mxu0 %vm208_vm2, %v1471_v33  ;;  %2862 = vmatmul.mubr.msk.f32.vlgmr.msra.gmra.mxu1 %vm208_vm2, %v3336_v20  ;;  %v2352_v22 = vrot.slane %v2351_v17, 1  ;;  %v2345_v8 = vrot.slane %v2344_v19, 1 }
  0xe0   : > { %2864 = vmatprep.mubr.msk.f32.mxu1 %vm208_vm2, %v1471_v33  ;;  %2716 = vmatpush1.msk.msra.mxu1 %vm217_vm1, %v1703_v46  ;;  %v2372_v33 = vmul.f32 0.25, %v2360_v28 }
  0xe1   : > { %1582 = vmatprep.mubr.f32.mxu0 %v3663_v2  ;;  %v1924_v50 = vsel %vm1922_vm9, %v2997_v49, %v2998_v48  ;;  %v1923_v53 = vsel %vm1922_vm9, %v1915_v52, %v2997_v49  ;;  %v2353_v27 = vadd.f32 %v2352_v22, %v2351_v17  ;;  %v2346_v30 = vadd.f32 %v2345_v8, %v2344_v19 }
  0xe2   : > { %v1907_v51 = vpop.permute.xlu0 %1906  ;;  %2726 = vmatprep.subr.msk.mxu0 %vm217_vm1, %v1924_v50 }
  0xe3   : > { %2709 = vmatmul.mubr.msk.f32.gmra.mxu0 %vm208_vm2, %v1473_v31  ;;  %2865 = vmatmul.mubr.msk.f32.gmra.mxu1 %vm208_vm2, %v1473_v31  ;;  %v2371_v35 = vmul.f32 0.25, %v2353_v27 }
  0xe4   : > { %2869 = vmatprep.mubr.msk.f32.mxu0 %vm208_vm2, %v1687_v34  ;;  %1784 = vmatprep.mubr.f32.mxu1 %v3663_v2 }
  0xe5   : > { %v2375_v43 = vmul.f32 0.1, %v2371_v35 }
  0xe6   : > { %v1911_v54 = vpop.permute.xlu0 %1910 }
  0xe7   : > { %2717 = vmatmul.mubr.msk.f32.vlgmr.msra.gmra.mxu1 %vm208_vm2, %v1687_v34  ;;  %2870 = vmatmul.mubr.msk.f32.vlgmr.msra.gmra.mxu0 %vm208_vm2, %v1689_v39  ;;  %v2370_v34 = vmul.f32 0.25, %v2346_v30 }
  0xe8   : > { %2727 = vmatpush1.msk.msra.mxu0 %vm217_vm1, %v1923_v53  ;;  %2872 = vmatprep.mubr.msk.f32.mxu0 %vm208_vm2, %v1691_v40 }
  0xe9   : > { %1790 = vmatprep.mubr.f32.mxu1 %v3663_v2  ;;  %2883 = vmatprep.subr.mxu0 %v3663_v2 }
  0xea   : > { %v1921_v55 = vpop.permute.xlu0 %1920 }
  0xeb   : > { %v1925_v56 = vsel %vm1922_vm9, %v2998_v48, %v1921_v55  ;;  %2718 = vmatmul.mubr.msk.f32.gmra.mxu1 %vm208_vm2, %v1689_v39  ;;  %2873 = vmatmul.mubr.msk.f32.gmra.mxu0 %vm208_vm2, %v1693_v44  ;;  %v2376_v39 = vmul.f32 0.1, %v2372_v33 }
  0xec   : > { %2875 = vmatprep.subr.msk.mxu1 %vm217_vm1, %v1925_v56  ;;  %1796 = vmatprep.mubr.f32.mxu1 %v3663_v2 }
  0xed   : > { %2876 = vmatpush3.msk.msra.mxu1 %vm217_vm1, %v1925_v56  ;;  %2004 = vmatprep.mubr.f32.mxu0 %v3663_v2 }
  0xee   : > { %2386 = vrot.lane.b32.xlu0 %v2376_v39, %s3077_s6 }
  0xef   : > { %2719 = vmatmul.mubr.msk.f32.gmra.mxu1 %vm208_vm2, %v1691_v40  ;;  %2728 = vmatmul.mubr.msk.f32.vlgmr.msra.gmra.mxu0 %vm208_vm2, %v1907_v51  ;;  %v2374_v40 = vmul.f32 0.1, %v2370_v34 }
  0xf0   : > { %1802 = vmatprep.mubr.f32.mxu1 %v3663_v2  ;;  %2010 = vmatprep.mubr.f32.mxu0 %v3663_v2 }
  0xf1   : > { %2382 = vrot.lane.b32.xlu1 %v2374_v40, %s3077_s6 }
  0xf3   : > { %2720 = vmatmul.mubr.msk.f32.gmra.mxu1 %vm208_vm2, %v1693_v44  ;;  %2729 = vmatmul.mubr.msk.f32.gmra.mxu0 %vm208_vm2, %v1909_v57  ;;  %v2373_v44 = vmul.f32 0.25, %v2368_v36 }
  0xf4   : > { %2877 = vmatprep.mubr.msk.f32.mxu1 %vm208_vm2, %v1907_v51  ;;  %2016 = vmatprep.mubr.f32.mxu0 %v3663_v2 }
  0xf5   : > { %2384 = vrot.lane.b32.xlu1 %v2375_v43, %s3077_s6  ;;  %v2377_v53 = vmul.f32 0.1, %v2373_v44 }
  0xf7   : > { %2730 = vmatmul.mubr.msk.f32.gmra.mxu0 %vm208_vm2, %v1911_v54  ;;  %2878 = vmatmul.mubr.msk.f32.vlgmr.msra.gmra.mxu1 %vm208_vm2, %v1909_v57 }
  0xf8   : > { %2880 = vmatprep.mubr.msk.f32.mxu1 %vm208_vm2, %v1911_v54  ;;  %2022 = vmatprep.mubr.f32.mxu0 %v3663_v2 }
  0xf9   : > { %2388 = vrot.lane.b32.xlu1 %v2377_v53, %s3077_s6 }
  0xfb   : > { %2731 = vmatmul.mubr.msk.f32.gmra.mxu0 %vm208_vm2, %v1913_v58  ;;  %2881 = vmatmul.mubr.msk.f32.gmra.mxu1 %vm208_vm2, %v1913_v58 }
  0xfc   : > { %2242 = vmatprep.mubr.f32.mxu1 %v3663_v2  ;;  %2891 = vmatprep.mubr.msk.f32.mxu0 %vm3087_vm10, %v3663_v2 }
 0x153   : > { %v290_v15 = vpop.f32.mrf.mxu0  ;;  %v308_v16 = vpop.f32.mrf.mxu1 }
 0x155   : > { %v292_v20 = vpop.f32.mrf.mxu0  ;;  %v310_v21 = vpop.f32.mrf.mxu1 }
 0x157   : > { %v296_v25 = vpop.f32.mrf.mxu0  ;;  %v2815_v26 = vpop.f32.mrf.mxu1 }
 0x159   : > { %v298_v31 = vpop.f32.mrf.mxu0  ;;  %v379_v32 = vpop.f32.mrf.mxu1 }
 0x15b   : > { %v302_v37 = vpop.f32.mrf.mxu0  ;;  %v2818_v38 = vpop.f32.mrf.mxu1 }
 0x15d   : > { %v304_v41 = vpop.f32.mrf.mxu0  ;;  %v389_v42 = vpop.f32.mrf.mxu1 }
 0x15f   : > { %v478_v45 = vpop.f32.mrf.mxu1  ;;  %v2823_v46 = vpop.f32.mrf.mxu0 }
 0x160   : > { %v479_v47 = vadd.f32 %v478_v45, %v290_v15  ;;  %v573_v48 = vadd.f32 %v2823_v46, %v2815_v26 }
 0x161   : > { %v480_v49 = vpop.f32.mrf.mxu1  ;;  %v567_v50 = vpop.f32.mrf.mxu0 }
 0x162   : > { %v481_v51 = vadd.f32 %v480_v49, %v292_v20  ;;  %v568_v52 = vadd.f32 %v567_v50, %v379_v32 }
 0x163   : > { %v484_v54 = vpop.f32.mrf.mxu1  ;;  %v2826_v55 = vpop.f32.mrf.mxu0 }
 0x164   : > { %v485_v56 = vadd.f32 %v484_v54, %v296_v25  ;;  %v3446_v57 = vadd.f32 %v2826_v55, %v2818_v38 }
 0x165   : > { %v486_v58 = vpop.f32.mrf.mxu1  ;;  %v577_v59 = vpop.f32.mrf.mxu0 }
 0x166   : > { %v487_v60 = vadd.f32 %v486_v58, %v298_v31  ;;  %v3448_v62 = vadd.f32 %v577_v59, %v389_v42 }
 0x167   : > { %v490_v63 = vpop.f32.mrf.mxu1  ;;  %v686_v0 = vpop.f32.mrf.mxu0 }
 0x168   : > { %v491_v1 = vadd.f32 %v490_v63, %v302_v37  ;;  %v794_v3 = vadd.f32 %v686_v0, %v479_v47 }
 0x169   : > { %v492_v7 = vpop.f32.mrf.mxu1  ;;  %v688_v6 = vpop.f32.mrf.mxu0 }
 0x16a   : > { %v493_v9 = vadd.f32 %v492_v7, %v304_v41  ;;  %v3451_v5 = vadd.f32 %v688_v6, %v481_v51 }
 0x16b   : > { %v496_v10 = vpop.f32.mrf.mxu1  ;;  %v692_v11 = vpop.f32.mrf.mxu0 }
 0x16c   : > { %v3453_v12 = vadd.f32 %v496_v10, %v308_v16  ;;  %v3455_v13 = vadd.f32 %v692_v11, %v485_v56 }
 0x16d   : > { %v498_v14 = vpop.f32.mrf.mxu1  ;;  %v694_v15 = vpop.f32.mrf.mxu0 }
 0x16e   : > { %v3457_v17 = vadd.f32 %v498_v14, %v310_v21  ;;  %v3459_v4 = vadd.f32 %v694_v15, %v487_v60 }
 0x16f   : > { %v698_v18 = vpop.f32.mrf.mxu0  ;;  %v2831_v19 = vpop.f32.mrf.mxu1 }
 0x170   : > { %v3461_v20 = vadd.f32 %v698_v18, %v491_v1  ;;  %v3463_v22 = vadd.f32 %v2831_v19, %v573_v48 }
 0x171   : > { %v700_v23 = vpop.f32.mrf.mxu0  ;;  %v775_v24 = vpop.f32.mrf.mxu1 }
 0x172   : > { %v3465_v8 = vadd.f32 %v700_v23, %v493_v9  ;;  %v3467_v16 = vadd.f32 %v775_v24, %v568_v52 }
 0x173   : > { %v704_v25 = vpop.f32.mrf.mxu0  ;;  %v2834_v26 = vpop.f32.mrf.mxu1 }
 0x175   : > { %v706_v27 = vpop.f32.mrf.mxu0  ;;  %v785_v28 = vpop.f32.mrf.mxu1 }
 0x177   : > { %v906_v21 = vpop.f32.mrf.mxu1  ;;  %v2839_v29 = vpop.f32.mrf.mxu0 }
 0x178   : > { %v3469_v30 = vadd.f32 %v906_v21, %v794_v3 }
 0x179   : > { %v908_v31 = vpop.f32.mrf.mxu1  ;;  %v995_v32 = vpop.f32.mrf.mxu0 }
 0x17b   : > { %v912_v33 = vpop.f32.mrf.mxu1  ;;  %v2842_v34 = vpop.f32.mrf.mxu0 }
 0x17d   : > { %v914_v35 = vpop.f32.mrf.mxu1  ;;  %v1005_v36 = vpop.f32.mrf.mxu0 }
 0x17f   : > { %v918_v37 = vpop.f32.mrf.mxu1  ;;  %v1126_v38 = vpop.f32.mrf.mxu0 }
 0x181   : > { %v920_v39 = vpop.f32.mrf.mxu1  ;;  %v1128_v40 = vpop.f32.mrf.mxu0 }
 0x183   : > { %v924_v41 = vpop.f32.mrf.mxu1  ;;  %v1132_v42 = vpop.f32.mrf.mxu0 }
 0x185   : > { %v926_v43 = vpop.f32.mrf.mxu1  ;;  %v1134_v44 = vpop.f32.mrf.mxu0 }
 0x187   : > { %v3471_v45 = vpop.f32.mrf.mxu0  ;;  %v3473_v46 = vpop.f32.mrf.mxu1 }
 0x189   : > { %v3475_v47 = vpop.f32.mrf.mxu0  ;;  %v3477_v48 = vpop.f32.mrf.mxu1 }
 0x18b   : > { %v3479_v49 = vpop.f32.mrf.mxu0  ;;  %v3481_v50 = vpop.f32.mrf.mxu1 }
 0x18d   : > { %v3483_v51 = vpop.f32.mrf.mxu0  ;;  %v3485_v52 = vpop.f32.mrf.mxu1 }
 0x18f   : > { %v3487_v53 = vpop.f32.mrf.mxu1  ;;  %v3489_v54 = vpop.f32.mrf.mxu0 }
 0x191   : > { %v3491_v55 = vpop.f32.mrf.mxu1  ;;  %v3493_v56 = vpop.f32.mrf.mxu0 }
 0x193   : > { %v3495_v58 = vpop.f32.mrf.mxu1  ;;  %v3497_v59 = vpop.f32.mrf.mxu0 }
 0x195   : > { %v3499_v60 = vpop.f32.mrf.mxu1  ;;  %v3501_v63 = vpop.f32.mrf.mxu0 }
 0x197   : > { %v3503_v0 = vpop.f32.mrf.mxu1  ;;  %v3505_v1 = vpop.f32.mrf.mxu0 }
 0x199   : > { %v3507_v3 = vpop.f32.mrf.mxu1  ;;  %v3509_v7 = vpop.f32.mrf.mxu0 }
 0x19b   : > { %v3511_v6 = vpop.f32.mrf.mxu1  ;;  %v3513_v9 = vpop.f32.mrf.mxu0 }
 0x19d   : > { %v3515_v10 = vpop.f32.mrf.mxu1  ;;  %v3517_v11 = vpop.f32.mrf.mxu0 }
 0x19e   : > { %3668 = vst [vmem:[#allocation3_spill] sm:$0xff] %v3515_v10  ;;  %3669 = vst [vmem:[#allocation4_spill] sm:$0xff] %v3517_v11 }
 0x19f   : > { %v3519_v14 = vpop.f32.mrf.mxu0  ;;  %v3521_v15 = vpop.f32.mrf.mxu1 }
 0x1a0   : > { %3670 = vst [vmem:[#allocation5_spill] sm:$0xff] %v3519_v14  ;;  %3671 = vst [vmem:[#allocation6_spill] sm:$0xff] %v3521_v15 }
 0x1a1   : > { %v3523_v18 = vpop.f32.mrf.mxu0  ;;  %v3525_v19 = vpop.f32.mrf.mxu1 }
 0x1a2   : > { %3672 = vst [vmem:[#allocation7_spill] sm:$0xff] %v3523_v18  ;;  %3673 = vst [vmem:[#allocation8_spill] sm:$0xff] %v3525_v19  ;;  %v803_v19 = vadd.f32 %v704_v25, %v3453_v12  ;;  %v1018_v12 = vadd.f32 %v914_v35, %v3459_v4 }
 0x1a3   : > { %v3527_v23 = vpop.f32.mrf.mxu0  ;;  %v3529_v24 = vpop.f32.mrf.mxu1 }
 0x1a4   : > { %3674 = vst [vmem:[#allocation9_spill] sm:$0xff] %v3527_v23  ;;  %3675 = vst [vmem:[#allocation10_spill] sm:$0xff] %v3529_v24  ;;  %v805_v24 = vadd.f32 %v2834_v26, %v3446_v57  ;;  %v1020_v26 = vadd.f32 %v918_v37, %v3461_v20 }
 0x1a5   : > { %v3531_v21 = vpop.f32.mrf.mxu0  ;;  %v3533_v2 = vpop.f32.mrf.mxu1 }
 0x1a6   : > { %3676 = vst [vmem:[#allocation11_spill] sm:$0xff] %v3531_v21  ;;  %3677 = vst [vmem:[#allocation12_spill] sm:$0xff] %v3533_v2  ;;  %v802_v21 = vadd.f32 %v785_v28, %v3448_v62  ;;  %v1234_v28 = vadd.f32 %v1126_v38, %v3469_v30  ;;  %v1240_v4 = vadd.f32 %v3471_v45, %v1020_v26 }
 0x1a7   : > { %v3535_v61 = vpop.f32.mrf.mxu1  ;;  %v3537_v10 = vpop.f32.mrf.mxu0 }
 0x1a8   : > { %3678 = vst [vmem:[#allocation13_spill] sm:$0xff] %v3535_v61  ;;  %3679 = vst [vmem:[#allocation14_spill] sm:$0xff] %v3537_v10  ;;  %v804_v10 = vadd.f32 %v706_v27, %v3457_v17  ;;  %v1025_v61 = vadd.f32 %v2842_v34, %v805_v24  ;;  %v1022_v57 = vadd.f32 %v1005_v36, %v802_v21 }
 0x1a9   : > { %v3539_v11 = vpop.f32.mrf.mxu1  ;;  %v3541_v14 = vpop.f32.mrf.mxu0  ;;  %v1021_v17 = vadd.f32 %v920_v39, %v3465_v8  ;;  %v1023_v27 = vadd.f32 %v924_v41, %v803_v19  ;;  %v1454_v38 = vadd.f32 %v3487_v53, %v1234_v28 }
 0x1aa   : > { %3680 = vst [vmem:[#allocation15_spill] sm:$0xff] %v3539_v11  ;;  %3681 = vst [vmem:[#allocation16_spill] sm:$0xff] %v3541_v14  ;;  %v1019_v11 = vadd.f32 %v2839_v29, %v3463_v22  ;;  %v1015_v14 = vadd.f32 %v908_v31, %v3451_v5  ;;  %v1024_v29 = vadd.f32 %v926_v43, %v804_v10 }
 0x1ab   : > { %v3543_v15 = vpop.f32.mrf.mxu1  ;;  %v3545_v18 = vpop.f32.mrf.mxu0  ;;  %v1243_v30 = vadd.f32 %v3479_v49, %v1023_v27  ;;  %v1245_v8 = vadd.f32 %v3481_v50, %v1025_v61  ;;  %v1242_v35 = vadd.f32 %v3485_v52, %v1022_v57  ;;  %v3691_v19 = vld [vmem:[#allocation10_spill] sm:$0xff] }
 0x1ac   : > { %3682 = vst [vmem:[#allocation17_spill] sm:$0xff] %v3543_v15  ;;  %3683 = vst [vmem:[#allocation18_spill] sm:$0xff] %v3545_v18  ;;  %v1016_v15 = vadd.f32 %v995_v32, %v3467_v16  ;;  %v1017_v18 = vadd.f32 %v912_v33, %v3455_v13  ;;  %v1235_v22 = vadd.f32 %v1128_v40, %v1015_v14 }
 0x1ad   : > { %v3550_v23 = vpop.f32.mrf.mxu1  ;;  %v3552_v2 = vpop.f32.mrf.mxu0  ;;  %v1238_v16 = vadd.f32 %v1134_v44, %v1018_v12  ;;  %v1239_v32 = vadd.f32 %v3473_v46, %v1019_v11  ;;  %v1241_v33 = vadd.f32 %v3475_v47, %v1021_v17  ;;  %v1244_v34 = vadd.f32 %v3483_v51, %v1024_v29  ;;  %v3692_v24 = vld [vmem:[#allocation11_spill] sm:$0xff]  ;;  %v3693_v21 = vld [vmem:[#allocation12_spill] sm:$0xff] }
 0x1ae   : > { %v1237_v5 = vadd.f32 %v1132_v42, %v1017_v18  ;;  %v1236_v20 = vadd.f32 %v3477_v48, %v1016_v15  ;;  %v1455_v40 = vadd.f32 %v3491_v55, %v1235_v22  ;;  %v1465_v43 = vadd.f32 %v3497_v59, %v1245_v8  ;;  %v2140_v51 = vpop.permute.xlu1 %2139 }
 0x1af   : > { %v1798_v25 = vpop.f32.mrf.mxu1  ;;  %v3560_v62 = vpop.f32.mrf.mxu0  ;;  %v1459_v39 = vadd.f32 %v3489_v54, %v1239_v32  ;;  %v1458_v61 = vadd.f32 %v3499_v60, %v1238_v16  ;;  %v1462_v44 = vadd.f32 %v3501_v63, %v1242_v35  ;;  %v1460_v47 = vadd.f32 %v3503_v0, %v1240_v4  ;;  %v3684_v54 = vld [vmem:[#allocation3_spill] sm:$0xff]  ;;  %v3686_v63 = vld [vmem:[#allocation5_spill] sm:$0xff]  ;;  %v3687_v0 = vld [vmem:[#allocation6_spill] sm:$0xff] }
 0x1b0   : > { %v1456_v41 = vadd.f32 %v3493_v56, %v1236_v20  ;;  %v1457_v42 = vadd.f32 %v3495_v58, %v1237_v5  ;;  %v1674_v48 = vadd.f32 %v3505_v1, %v1454_v38  ;;  %v1461_v49 = vadd.f32 %v3507_v3, %v1241_v33  ;;  %v3685_v56 = vld [vmem:[#allocation4_spill] sm:$0xff]  ;;  %v3688_v1 = vld [vmem:[#allocation7_spill] sm:$0xff]  ;;  %v3689_v3 = vld [vmem:[#allocation9_spill] sm:$0xff] }
 0x1b1   : > { %v1800_v31 = vpop.f32.mrf.mxu1  ;;  %v3565_v13 = vpop.f32.mrf.mxu0  ;;  %v1463_v50 = vadd.f32 %v3511_v6, %v1243_v30  ;;  %v1675_v52 = vadd.f32 %v3509_v7, %v1455_v40  ;;  %v1464_v55 = vadd.f32 %v3684_v54, %v1244_v34  ;;  %v1678_v58 = vadd.f32 %v3685_v56, %v1458_v61  ;;  %v3690_v6 = vld [vmem:[#allocation8_spill] sm:$0xff]  ;;  %v3694_v28 = vld [vmem:[#allocation13_spill] sm:$0xff]  ;;  %v3695_v22 = vld [vmem:[#allocation14_spill] sm:$0xff] }
 0x1b2   : > { %v1677_v53 = vadd.f32 %v3513_v9, %v1457_v42  ;;  %v1680_v10 = vadd.f32 %v3686_v63, %v1460_v47  ;;  %v1679_v11 = vadd.f32 %v3687_v0, %v1459_v39  ;;  %v1681_v14 = vadd.f32 %v3688_v1, %v1461_v49  ;;  %v3696_v16 = vld [vmem:[#allocation16_spill] sm:$0xff]  ;;  %v2132_v35 = vpop.permute.xlu1 %2131 }
 0x1b3   : > { %v1804_v36 = vpop.f32.mrf.mxu1  ;;  %v2012_v37 = vpop.f32.mrf.mxu0  ;;  %v1683_v15 = vadd.f32 %v3689_v3, %v1463_v50  ;;  %v1676_v18 = vadd.f32 %v3690_v6, %v1456_v41  ;;  %v1685_v7 = vadd.f32 %v3691_v19, %v1465_v43  ;;  %v1684_v9 = vadd.f32 %v3692_v24, %v1464_v55  ;;  %v3697_v32 = vld [vmem:[#allocation18_spill] sm:$0xff]  ;;  %v3698_v42 = vld [vmem:[#allocation17_spill] sm:$0xff] }
 0x1b4   : > { %v1682_v12 = vadd.f32 %v3693_v21, %v1462_v44  ;;  %v1894_v17 = vadd.f32 %v3694_v28, %v1674_v48  ;;  %v1899_v27 = vadd.f32 %v3695_v22, %v1679_v11  ;;  %v1901_v5 = vadd.f32 %v1800_v31, %v1681_v14  ;;  %v3699_v48 = vld [vmem:[#allocation15_spill] sm:$0xff] }
 0x1b5   : > { %v1806_v45 = vpop.f32.mrf.mxu1  ;;  %v2014_v46 = vpop.f32.mrf.mxu0  ;;  %v1903_v29 = vadd.f32 %v1804_v36, %v1683_v15  ;;  %v1896_v4 = vadd.f32 %v3696_v16, %v1676_v18  ;;  %v1905_v33 = vadd.f32 %v3697_v32, %v1685_v7  ;;  %v1898_v20 = vadd.f32 %v3550_v23, %v1678_v58 }
 0x1b6   : > { %v1900_v30 = vadd.f32 %v1798_v25, %v1680_v10  ;;  %v1902_v38 = vadd.f32 %v3552_v2, %v1682_v12  ;;  %v1904_v39 = vadd.f32 %v1806_v45, %v1684_v9  ;;  %v1897_v43 = vadd.f32 %v3698_v42, %v1677_v53  ;;  %v2136_v23 = vpop.permute.xlu0 %2135  ;;  %v2128_v1 = vpop.permute.xlu1 %2127 }
 0x1b7   : > { %v2018_v59 = vpop.f32.mrf.mxu0  ;;  %v2879_v60 = vpop.f32.mrf.mxu1  ;;  %v1895_v49 = vadd.f32 %v3699_v48, %v1675_v52  ;;  %v2118_v50 = vadd.f32 %v2014_v46, %v1898_v20  ;;  %v3700_v19 = vmov 0.0  }
 0x1b8   : > { %v2120_v61 = vadd.f32 %v2018_v59, %v1900_v30  ;;  %v2119_v31 = vadd.f32 %v2879_v60, %v1899_v27  ;;  %v2117_v55 = vadd.f32 %v2012_v37, %v1897_v43  ;;  %v2114_v59 = vadd.f32 %v3560_v62, %v1894_v17 }
 0x1b9   : > { %v2020_v57 = vpop.f32.mrf.mxu0  ;;  %v2095_v26 = vpop.f32.mrf.mxu1  ;;  %v2115_v45 = vadd.f32 %v3565_v13, %v1895_v49  ;;  %v2146_v52 = vadd.f32 %v2132_v35, %v2118_v50  ;;  %v3089_v43 = vmov 1966171168  }
 0x1ba   : > { %v2121_v40 = vadd.f32 %v2020_v57, %v1901_v5  ;;  %v2116_v56 = vadd.f32 %v2095_v26, %v1896_v4  ;;  %v2147_v60 = vadd.f32 %v2132_v35, %v2119_v31  ;;  %v2148_v0 = vadd.f32 %v2136_v23, %v2120_v61  ;;  %v3701_v57 = vld [vmem:[#allocation2_spill] sm:$0xff]  ;;  %v2169_v22 = vpop.permute.xlu0 %2168 }
 0x1bb   : > { %v2024_v8 = vpop.f32.mrf.mxu0  ;;  %v2882_v34 = vpop.f32.mrf.mxu1  ;;  %v2145_v3 = vadd.f32 %v2132_v35, %v2117_v55  ;;  %v2143_v6 = vadd.f32 %v2128_v1, %v2115_v45  ;;  %v2142_v13 = vadd.f32 %v2128_v1, %v2114_v59  ;;  %v2158_v62 = vmax.f32 %v2146_v52, 0.0 }
 0x1bc   : > { %v2123_v41 = vadd.f32 %v2024_v8, %v1903_v29  ;;  %v2125_v36 = vadd.f32 %v2882_v34, %v1905_v33  ;;  %v2149_v63 = vadd.f32 %v2136_v23, %v2121_v40  ;;  %v2144_v15 = vadd.f32 %v2128_v1, %v2116_v56 }
 0x1bd   : > { %v2026_v44 = vpop.f32.mrf.mxu0  ;;  %v2105_v47 = vpop.f32.mrf.mxu1  ;;  %v2160_v7 = vmax.f32 %v2148_v0, 0.0  ;;  %v2157_v24 = vmax.f32 %v2145_v3, 0.0  ;;  %v2155_v21 = vmax.f32 %v2143_v6, 0.0  ;;  %v2154_v12 = vmax.f32 %v2142_v13, 0.0 }
 0x1be   : > { %v2124_v25 = vadd.f32 %v2026_v44, %v1904_v39  ;;  %v2122_v54 = vadd.f32 %v2105_v47, %v1902_v38  ;;  %v2151_v58 = vadd.f32 %v2140_v51, %v2123_v41  ;;  %v2153_v2 = vadd.f32 %v2140_v51, %v2125_v36  ;;  %v2383_v0 = vpop.permute.xlu1 %2382 }
 0x1bf   : > { %v2161_v18 = vmax.f32 %v2149_v63, 0.0  ;;  %v2156_v9 = vmax.f32 %v2144_v15, 0.0  ;;  %v2171_v26 = vlaneseq  ;;  %v2518_v61 = vunpack.c.l.s4 %v3089_v43 }
 0x1c0   : > { %v2152_v10 = vadd.f32 %v2140_v51, %v2124_v25  ;;  %v2150_v53 = vadd.f32 %v2136_v23, %v2122_v54  ;;  %v2165_v11 = vmax.f32 %v2153_v2, 0.0  ;;  %v2163_v37 = vmax.f32 %v2151_v58, 0.0 }
 0x1c1   : > { %v2159_v51 = vmax.f32 %v2147_v60, 0.0  ;;  %v2172_v28 = vshrl.u32 %v2171_v26, 7  ;;  %v2519_v31 = vunpack.c.0.s8 %v2518_v61  ;;  %vm3619_vm14 = vcmp.lt.s32.totalorder %v2171_v26, 384 }
 0x1c2   : > { %v2164_v46 = vmax.f32 %v2152_v10, 0.0  ;;  %v2162_v14 = vmax.f32 %v2150_v53, 0.0  ;;  %2884 = vmatpush3.msra.mxu0 %v2165_v11  ;;  %v2385_v15 = vpop.permute.xlu1 %2384 }
 0x1c3   : > { %2885 = vmatprep.subr.mxu0 %v3700_v19  ;;  %v2173_v17 = vsub.s32 0, %v2172_v28  ;;  %v3615_v48 = vsub.s32 %v2519_v31, %v2172_v28 }
 0x1c4   : > { %2202 = vmatprep.subr.mxu1 %v2164_v46  ;;  %2886 = vmatpush3.msra.mxu0 %v2162_v14 }
 0x1c5   : > { %2203 = vmatpush1.msra.mxu1 %v2163_v37  ;;  %2887 = vmatprep.subr.mxu0 %v3700_v19  ;;  %v2174_v27 = vrot.slane %v2169_v22, %v2173_v17  ;;  %v2387_v37 = vpop.permute.xlu0 %2386 }
 0x1c6   : > { %2204 = vmatprep.subr.mxu1 %v2161_v18  ;;  %2888 = vmatpush3.msra.mxu0 %v2159_v51  ;;  %v2389_v6 = vpop.permute.xlu1 %2388 }
 0x1c7   : > { %2205 = vmatpush1.msra.mxu1 %v2160_v7  ;;  %2889 = vmatprep.subr.mxu0 %v3700_v19  ;;  %v2392_v18 = vsel %vm1042_vm5, %v2387_v37, %v2389_v6  ;;  %v2390_v19 = vsel %vm1042_vm5, %v2383_v0, %v2385_v15  ;;  %v2391_v7 = vsel %vm1042_vm5, %v2385_v15, %v2387_v37 }
 0x1c8   : > { %2206 = vmatprep.subr.mxu1 %v2158_v62  ;;  %2890 = vmatpush3.msra.mxu0 %v2156_v9 }
 0x1c9   : > { %2207 = vmatpush1.msra.mxu1 %v2157_v24  ;;  %2892 = vmatmul.mubr.msk.f32.vlgmr.msra.gmra.mxu0 %vm2175_vm13, %v3701_v57 }
 0x1ca   : > { %2208 = vmatprep.subr.mxu1 %v2155_v21 }
 0x1cb   : > { %2209 = vmatpush1.msra.mxu1 %v2154_v12 }
 0x1cc   : > { %2737 = vmatmul.mubr.msk.f32.vlgmr.msra.gmra.mxu1 %vm2175_vm13, %v3701_v57 }
 0x289   : > { %v2315_v5 = vpop.f32.mrf.mxu0 }
 0x28a   : > { %v2316_v29 = vadd.f32 %v2315_v5, %v2174_v27 }
 0x28b   : > { %v2893_v4 = vpop.f32.mrf.mxu0 }
 0x28c   : > { %v2244_v16 = vpop.f32.mrf.mxu1  ;;  %v2741_v32 = vmul.f32 -1.442695, %v2316_v29 }
 0x28d   : > { %v2245_v33 = vadd.f32 %v2244_v16, %v2174_v27 }
 0x28e   : > { %v2246_v20 = vpop.f32.mrf.mxu1  ;;  %3002 = vpow2.f32 %v2741_v32 }
 0x28f   : > { %v2739_v30 = vmul.f32 -1.442695, %v2245_v33  ;;  %v2247_v8 = vadd.f32 %v2246_v20, %v2174_v27 }
 0x291   : > { %3004 = vpow2.f32 %v2739_v30  ;;  %v2740_v34 = vmul.f32 -1.442695, %v2247_v8 }
 0x293   : > { %3006 = vpow2.f32 %v2740_v34 }
 0x29b   : > { %v3003_v35 = vpop.eup %3002 }
 0x29c   : > { %v2330_v38 = vadd.f32 1.0, %v3003_v35 }
 0x29e   : > { %v3005_v39 = vpop.eup %3004  ;;  %3008 = vrcp.f32 %v2330_v38 }
 0x29f   : > { %v2328_v40 = vadd.f32 1.0, %v3005_v39 }
 0x2a0   : > { %v3007_v41 = vpop.eup %3006 }
 0x2a1   : > { %3010 = vrcp.f32 %v2328_v40  ;;  %v2329_v42 = vadd.f32 1.0, %v3007_v41 }
 0x2a3   : > { %3012 = vrcp.f32 %v2329_v42 }
 0x2ab   : > { %v3009_v36 = vpop.eup %3008 }
 0x2ac   : > { %v2401_v44 = vmul.f32 2.0, %v3009_v36  ;;  %v2530_v58 = vrot.slane %v3009_v36, %v3615_v48  ;;  %v3635_v24 = vadd.f32 %v3009_v36, %v2392_v18 }
 0x2ae   : > { %v3011_v47 = vpop.eup %3010  ;;  %v2744_v50 = vadd.f32 -1.0, %v2401_v44 }
 0x2af   : > { %v2399_v49 = vmul.f32 2.0, %v3011_v47  ;;  %v3637_v21 = vadd.f32 %v3011_v47, %v2390_v19 }
 0x2b0   : > { %v3013_v23 = vpop.eup %3012  ;;  %v2747_v56 = vmul.f32 -1.442695, %v2744_v50 }
 0x2b1   : > { %v2516_v25 = vcombine.low %v3011_v47, %v3013_v23  ;;  %v2742_v54 = vadd.f32 -1.0, %v2399_v49  ;;  %v2400_v55 = vmul.f32 2.0, %v3013_v23  ;;  %v3641_v28 = vadd.f32 %v3013_v23, %v2391_v7 }
 0x2b2   : > { %3014 = vpow2.f32 %v2747_v56 }
 0x2b3   : > { %v2523_v2 = vrot.slane %v2516_v25, %v3615_v48  ;;  %v2745_v45 = vmul.f32 -1.442695, %v2742_v54  ;;  %v2743_v63 = vadd.f32 -1.0, %v2400_v55 }
 0x2b5   : > { %v2531_v10 = vcombine.low %v2523_v2, %v2530_v58  ;;  %3016 = vpow2.f32 %v2745_v45  ;;  %v2746_v53 = vmul.f32 -1.442695, %v2743_v63 }
 0x2b7   : > { %v2538_v60 = vrot.slane %v2531_v10, %v3615_v48  ;;  %3018 = vpow2.f32 %v2746_v53 }
 0x2b9   : > { %2544 = vst.msk [vmem:[%s3626_s22] ss:$2 sm:$0x7] %vm3619_vm14, %v2538_v60 }
 0x2bf   : > { %v3015_v11 = vpop.eup %3014 }
 0x2c0   : > { %v2416_v52 = vadd.f32 1.0, %v3015_v11 }
 0x2c2   : > { %v3017_v1 = vpop.eup %3016  ;;  %3020 = vrcp.f32 %v2416_v52 }
 0x2c3   : > { %v2414_v46 = vadd.f32 1.0, %v3017_v1 }
 0x2c4   : > { %v3019_v14 = vpop.eup %3018 }
 0x2c5   : > { %3022 = vrcp.f32 %v2414_v46  ;;  %v2415_v3 = vadd.f32 1.0, %v3019_v14 }
 0x2c7   : > { %3024 = vrcp.f32 %v2415_v3 }
 0x2cf   : > { %v3021_v13 = vpop.eup %3020 }
 0x2d0   : > { %v2425_v62 = vmul.f32 1.1, %v3021_v13 }
 0x2d2   : > { %v3023_v51 = vpop.eup %3022  ;;  %v2428_v57 = vsub.f32 %v2425_v62, %v3635_v24 }
 0x2d3   : > { %v2423_v9 = vmul.f32 1.1, %v3023_v51 }
 0x2d4   : > { %v3025_v12 = vpop.eup %3024  ;;  %v2431_v22 = vmul.f32 0.5, %v2428_v57 }
 0x2d5   : > { %v2426_v26 = vsub.f32 %v2423_v9, %v3637_v21  ;;  %v2424_v17 = vmul.f32 1.1, %v3025_v12 }
 0x2d6   : > { %v2434_v29 = vsub.f32 %v2744_v50, %v2431_v22 }
 0x2d7   : > { %v2429_v27 = vmul.f32 0.5, %v2426_v26  ;;  %v2427_v5 = vsub.f32 %v2424_v17, %v3641_v28 }
 0x2d8   : > { %v2750_v32 = vmul.f32 -1.442695, %v2434_v29 }
 0x2d9   : > { %v2432_v16 = vsub.f32 %v2742_v54, %v2429_v27  ;;  %v2430_v4 = vmul.f32 0.5, %v2427_v5 }
 0x2da   : > { %3026 = vpow2.f32 %v2750_v32 }
 0x2db   : > { %v2748_v33 = vmul.f32 -1.442695, %v2432_v16  ;;  %v2433_v20 = vsub.f32 %v2743_v63, %v2430_v4 }
 0x2dd   : > { %3028 = vpow2.f32 %v2748_v33  ;;  %v2749_v30 = vmul.f32 -1.442695, %v2433_v20 }
 0x2df   : > { %3030 = vpow2.f32 %v2749_v30 }
 0x2e7   : > { %v3027_v8 = vpop.eup %3026 }
 0x2e8   : > { %v2446_v35 = vadd.f32 1.0, %v3027_v8 }
 0x2ea   : > { %v3029_v34 = vpop.eup %3028  ;;  %3032 = vrcp.f32 %v2446_v35 }
 0x2eb   : > { %v2444_v38 = vadd.f32 1.0, %v3029_v34 }
 0x2ec   : > { %v3031_v39 = vpop.eup %3030 }
 0x2ed   : > { %3034 = vrcp.f32 %v2444_v38  ;;  %v2445_v40 = vadd.f32 1.0, %v3031_v39 }
 0x2ef   : > { %3036 = vrcp.f32 %v2445_v40 }
 0x2f7   : > { %v3033_v41 = vpop.eup %3032 }
 0x2f8   : > { %v2455_v43 = vmul.f32 1.1, %v3033_v41 }
 0x2fa   : > { %v3035_v42 = vpop.eup %3034  ;;  %v2458_v36 = vsub.f32 %v2455_v43, %v3635_v24 }
 0x2fb   : > { %v2453_v61 = vmul.f32 1.1, %v3035_v42 }
 0x2fc   : > { %v3037_v31 = vpop.eup %3036  ;;  %v2461_v49 = vmul.f32 0.5, %v2458_v36 }
 0x2fd   : > { %v2456_v44 = vsub.f32 %v2453_v61, %v3637_v21  ;;  %v2454_v47 = vmul.f32 1.1, %v3037_v31 }
 0x2fe   : > { %v2464_v25 = vsub.f32 %v2434_v29, %v2461_v49 }
 0x2ff   : > { %v2459_v50 = vmul.f32 0.5, %v2456_v44  ;;  %v2457_v23 = vsub.f32 %v2454_v47, %v3641_v28 }
 0x300   : > { %v2753_v56 = vmul.f32 -1.442695, %v2464_v25 }
 0x301   : > { %v2462_v54 = vsub.f32 %v2432_v16, %v2459_v50  ;;  %v2460_v55 = vmul.f32 0.5, %v2457_v23 }
 0x302   : > { %3038 = vpow2.f32 %v2753_v56 }
 0x303   : > { %v2751_v58 = vmul.f32 -1.442695, %v2462_v54  ;;  %v2463_v2 = vsub.f32 %v2433_v20, %v2460_v55 }
 0x305   : > { %3040 = vpow2.f32 %v2751_v58  ;;  %v2752_v45 = vmul.f32 -1.442695, %v2463_v2 }
 0x307   : > { %3042 = vpow2.f32 %v2752_v45 }
 0x30f   : > { %v3039_v63 = vpop.eup %3038 }
 0x310   : > { %v2476_v53 = vadd.f32 1.0, %v3039_v63 }
 0x312   : > { %v3041_v10 = vpop.eup %3040  ;;  %3044 = vrcp.f32 %v2476_v53 }
 0x313   : > { %v2474_v60 = vadd.f32 1.0, %v3041_v10 }
 0x314   : > { %v3043_v0 = vpop.eup %3042 }
 0x315   : > { %3046 = vrcp.f32 %v2474_v60  ;;  %v2475_v11 = vadd.f32 1.0, %v3043_v0 }
 0x317   : > { %3048 = vrcp.f32 %v2475_v11 }
 0x31f   : > { %v3045_v1 = vpop.eup %3044 }
 0x320   : > { %v2485_v46 = vmul.f32 1.1, %v3045_v1 }
 0x322   : > { %v3047_v52 = vpop.eup %3046  ;;  %v2488_v15 = vsub.f32 %v2485_v46, %v3635_v24 }
 0x323   : > { %v2483_v14 = vmul.f32 1.1, %v3047_v52 }
 0x324   : > { %v3049_v3 = vpop.eup %3048  ;;  %v2491_v18 = vmul.f32 0.5, %v2488_v15 }
 0x325   : > { %v2486_v37 = vsub.f32 %v2483_v14, %v3637_v21  ;;  %v2484_v6 = vmul.f32 1.1, %v3049_v3 }
 0x326   : > { %v2494_v51 = vsub.f32 %v2464_v25, %v2491_v18 }
 0x327   : > { %v2489_v19 = vmul.f32 0.5, %v2486_v37  ;;  %v2487_v13 = vsub.f32 %v2484_v6, %v3641_v28 }
 0x328   : > { %v2756_v9 = vmul.f32 -1.442695, %v2494_v51 }
 0x329   : > { %v2492_v7 = vsub.f32 %v2462_v54, %v2489_v19  ;;  %v2490_v62 = vmul.f32 0.5, %v2487_v13 }
 0x32a   : > { %3050 = vpow2.f32 %v2756_v9 }
 0x32b   : > { %v2754_v12 = vmul.f32 -1.442695, %v2492_v7  ;;  %v2493_v57 = vsub.f32 %v2463_v2, %v2490_v62 }
 0x32d   : > { %3052 = vpow2.f32 %v2754_v12  ;;  %v2755_v26 = vmul.f32 -1.442695, %v2493_v57 }
 0x32f   : > { %3054 = vpow2.f32 %v2755_v26 }
 0x337   : > { %v3051_v17 = vpop.eup %3050 }
 0x338   : > { %v2506_v24 = vadd.f32 1.0, %v3051_v17 }
 0x33a   : > { %v3053_v22 = vpop.eup %3052  ;;  %3056 = vrcp.f32 %v2506_v24 }
 0x33b   : > { %v2504_v21 = vadd.f32 1.0, %v3053_v22 }
 0x33c   : > { %v3055_v27 = vpop.eup %3054 }
 0x33d   : > { %v2505_v5 = vadd.f32 1.0, %v3055_v27  ;;  %3058 = vrcp.f32 %v2504_v21 }
 0x33f   : > { %3060 = vrcp.f32 %v2505_v5 }
 0x347   : > { %v3057_v28 = vpop.eup %3056 }
 0x348   : > { %v2562_v33 = vrot.slane %v3057_v28, %v3615_v48 }
 0x34a   : > { %v3059_v29 = vpop.eup %3058 }
 0x34c   : > { %v3061_v16 = vpop.eup %3060 }
 0x34d   : > { %v2548_v4 = vcombine.low %v3059_v29, %v3061_v16 }
 0x34f   : > { %v2555_v32 = vrot.slane %v2548_v4, %v3615_v48 }
 0x351   : > { %v2563_v20 = vcombine.low %v2555_v32, %v2562_v33 }
 0x353   : > { %v2570_v30 = vrot.slane %v2563_v20, %v3615_v48 }
 0x355   : > { %2757 = vst.msk [vmem:[%s3626_s22 + $0x1] ss:$2 sm:$0x7] %vm3619_vm14, %v2570_v30 }
 0x356 PF: > { %s13_s12 = sadd.s32 1, %s3068_s12  }
 0x357   : > { %p10_p5 = scmp.ge.s32.totalorder %s13_s12, 4  }
 0x359   :  { %12 = sbr.rel (!%p10_p5) target bundleno = 1 (0x1), region = 63 }

</bundles_post_ra>
